<compile_context>
chip_gen: v6e
topology: v6e:2x2x1
jax: 0.10.0
libtpu: 0.0.40
codegen_flags: <defaults>
</compile_context>

<pallas_src>
import math

import jax
import jax.numpy as jnp
from jax.experimental import pallas as pl
from jax.experimental.pallas import tpu as pltpu

FPAD = 128                                # lane-dense padded feature width
_VMEM_RESIDENT_BUDGET = 40 * 1024 * 1024  # conservative: fits v7x's 64 MiB VMEM
_VMEM_LIMIT_CAP = 48 * 1024 * 1024        # v7x-safe; v5e/v6e could use ~100 MiB


def _round_up(v, m):
    return (v + m - 1) // m * m


# -----------------------------------------------------------------------------
# Wrapper: pad everything to lane-dense bf16 slabs and launch the fused kernel.
# -----------------------------------------------------------------------------
def gcn_deep_forward(params, x, adj):
    """params: list of (W, b) per layer, W: (fin, fout) f32, b: (fout,) f32."""
    n, nfeat = x.shape
    nlayers = len(params)
    nout = params[-1][0].shape[1]
    n_pad = _round_up(n, 128)   # lane-dense adjacency columns, sublane-aligned rows

    # Resident-footprint check + explicit VMEM limit (perf review items).
    resident_bytes = (
        n_pad * n_pad * 2                 # adjacency, bf16, resident all layers
        + n_pad * FPAD * 2                # x / h activations (bf16)
        + nlayers * FPAD * FPAD * 2       # weight slab (bf16)
        + nlayers * FPAD * 4              # bias slab (f32)
        + n_pad * FPAD * 4                # f32 output block
        + 4 * n_pad * FPAD * 4)           # headroom for ah / lin / h temporaries
    if resident_bytes > _VMEM_RESIDENT_BUDGET:
        # TODO(synk): fall back to a streaming, K-tiled aggregation kernel here.
        raise NotImplementedError(
            f"graph too large for the VMEM-resident fused GCN kernel "
            f"({resident_bytes} bytes needed)")
    vmem_limit = int(min(max(2 * resident_bytes, 32 * 1024 * 1024),
                         _VMEM_LIMIT_CAP))

    # Layout plumbing (once, outside the kernel): zero-pad to lane-dense
    # 128-wide bf16 slabs.  Padded rows/cols are exactly zero, the 0/1
    # adjacency is exact in bf16, so the valid output region is unaffected.
    # (Padded *rows* of the hidden state become relu(b) after layer 1, but the
    #  padded adjacency columns are zero so they never reach valid rows.)
    x_pad = jnp.zeros((n_pad, FPAD), jnp.bfloat16)
    x_pad = x_pad.at[:n, :nfeat].set(x.astype(jnp.bfloat16))
    a_pad = jnp.zeros((n_pad, n_pad), jnp.bfloat16)
    a_pad = a_pad.at[:n, :n].set(adj.astype(jnp.bfloat16))
    w_slab = jnp.zeros((nlayers, FPAD, FPAD), jnp.bfloat16)
    b_slab = jnp.zeros((nlayers, 1, FPAD), jnp.float32)
    for l, (w, b) in enumerate(params):
        fin, fout = w.shape
        w_slab = w_slab.at[l, :fin, :fout].set(w.astype(jnp.bfloat16))
        b_slab = b_slab.at[l, 0, :fout].set(b)

    # ------------------------------------------------------------------
    # Fused kernel: whole GCN stack in one invocation, everything in VMEM.
    # ------------------------------------------------------------------
    def _gcn_deep_kernel(a_ref, x_ref, w_ref, b_ref, o_ref):
        h = x_ref[...]                                   # (n_pad, FPAD) bf16
        for l in range(nlayers):                         # static unroll (small)
            # (A @ h) @ W_l + b_l  -- both matmuls bf16 x bf16, f32 accumulate.
            ah = jnp.dot(a_ref[...], h, preferred_element_type=jnp.float32)
            lin = jnp.dot(ah.astype(jnp.bfloat16), w_ref[l],
                          preferred_element_type=jnp.float32) + b_ref[l]
            if l < nlayers - 1:
                # ReLU on all but the last layer.
                # TODO(synk): F.dropout with training=True not implemented
                # (eval-mode identity); a training variant would draw a
                # pltpu.prng_* mask here.
                h = jnp.maximum(lin, 0.0).astype(jnp.bfloat16)
            else:
                o_ref[...] = lin                         # single f32 writeback

    flops = nlayers * (2 * n_pad * n_pad * FPAD + 2 * n_pad * FPAD * FPAD)
    bytes_accessed = (n_pad * n_pad * 2                  # adjacency (once!)
                      + n_pad * FPAD * 2                 # x
                      + nlayers * (FPAD * FPAD * 2 + FPAD * 4)
                      + n_pad * FPAD * 4)                # output

    out_pad = pl.pallas_call(
        _gcn_deep_kernel,
        out_shape=jax.ShapeDtypeStruct((n_pad, FPAD), jnp.float32),
        compiler_params=pltpu.CompilerParams(vmem_limit_bytes=vmem_limit),
        cost_estimate=pl.CostEstimate(flops=flops, transcendentals=0,
                                      bytes_accessed=bytes_accessed),
    )(a_pad, x_pad, w_slab, b_slab)

    return out_pad[:n, :nout]


# -----------------------------------------------------------------------------
# Pure-JAX reference (mirrors the kernel's bf16 operands / f32 accumulation).
# -----------------------------------------------------------------------------
def ref_forward(params, x, adj):
    a16 = adj.astype(jnp.bfloat16)
    h = x.astype(jnp.bfloat16)
    out = None
    nlayers = len(params)
    for l, (w, b) in enumerate(params):
        ah = jnp.dot(a16, h, preferred_element_type=jnp.float32)
        lin = jnp.dot(ah.astype(jnp.bfloat16), w.astype(jnp.bfloat16),
                      preferred_element_type=jnp.float32) + b
        if l < nlayers - 1:
            h = jnp.maximum(lin, 0.0).astype(jnp.bfloat16)
        else:
            out = lin
        # F.dropout(..., training) -> identity (eval-mode forward)
    return out


def init_params(key, nfeat, nhid, nout, nlayers):
    dims = [nfeat] + [nhid] * (nlayers - 1) + [nout]
    params = []
    for fin, fout in zip(dims[:-1], dims[1:]):
        kw, kb, key = jax.random.split(key, 3)
        lim = 1.0 / math.sqrt(float(fout))               # pygcn-style init
        w = jax.random.uniform(kw, (fin, fout), jnp.float32, -lim, lim)
        b = jax.random.uniform(kb, (fout,), jnp.float32, -lim, lim)
        params.append((w, b))
    return params


if __name__ == "__main__":
    nfeat, nhid, nout, nlayers = 16, 32, 16, 4
    dropout = 0.5        # identity in this (eval-mode) forward
    N = 256              # number of graph nodes

    key = jax.random.PRNGKey(0)
    k_x, k_a, k_p = jax.random.split(key, 3)

    x = jax.random.normal(k_x, (N, nfeat), jnp.float32)
    a = (jax.random.uniform(k_a, (N, N)) < 0.05).astype(jnp.float32)
    adj = jnp.maximum(a, a.T)            # symmetric dense 0/1 adjacency

    params = init_params(k_p, nfeat, nhid, nout, nlayers)

    fwd = jax.jit(gcn_deep_forward)
    out = fwd(params, x, adj)
    out = jax.block_until_ready(out)
    assert out.shape == (N, nout)

    ref = ref_forward(params, x, adj)
    max_err = float(jnp.max(jnp.abs(out - ref)))
    assert max_err < 5e-2, f"mismatch vs reference: {max_err}"

    print("KERNEL_OK")
</pallas_src>

<mosaic_0001>
module attributes {stable_mosaic.version = 11 : i64} {
  func.func @_gcn_deep_kernel(%arg0: memref<256x256xbf16, #tpu.memory_space<vmem>>, %arg1: memref<256x128xbf16, #tpu.memory_space<vmem>>, %arg2: memref<4x128x128xbf16, #tpu.memory_space<vmem>>, %arg3: memref<4x1x128xf32, #tpu.memory_space<vmem>>, %arg4: memref<256x128xf32, #tpu.memory_space<vmem>>) attributes {dimension_semantics = [], scalar_prefetch = 0 : i64, scratch_operands = 0 : i64, tpu.core_type = #tpu.core_type<tc>} {
    %c0 = arith.constant 0 : index
    %c0_0 = arith.constant 0 : index
    %0 = vector.load %arg1[%c0, %c0_0] : memref<256x128xbf16, #tpu.memory_space<vmem>>, vector<256x128xbf16>
    %c0_1 = arith.constant 0 : index
    %c0_2 = arith.constant 0 : index
    %1 = vector.load %arg0[%c0_1, %c0_2] : memref<256x256xbf16, #tpu.memory_space<vmem>>, vector<256x256xbf16>
    %cst = arith.constant dense<0.000000e+00> : vector<256x128xf32>
    %2 = tpu.matmul %1, %0, %cst {dimension_numbers = #tpu.dot_dimension_numbers<[1], [0], [0], [1], [0, 0, 1, 1], [], []>} : vector<256x256xbf16>, vector<256x128xbf16>, vector<256x128xf32> -> vector<256x128xf32>
    %3 = arith.truncf %2 : vector<256x128xf32> to vector<256x128xbf16>
    %c0_3 = arith.constant 0 : index
    %c0_4 = arith.constant 0 : index
    %c0_5 = arith.constant 0 : index
    %4 = vector.load %arg2[%c0_3, %c0_4, %c0_5] : memref<4x128x128xbf16, #tpu.memory_space<vmem>>, vector<1x128x128xbf16>
    %5 = vector.shape_cast %4 : vector<1x128x128xbf16> to vector<128x128xbf16>
    %cst_6 = arith.constant dense<0.000000e+00> : vector<256x128xf32>
    %6 = tpu.matmul %3, %5, %cst_6 {dimension_numbers = #tpu.dot_dimension_numbers<[1], [0], [0], [1], [0, 0, 1, 1], [], []>} : vector<256x128xbf16>, vector<128x128xbf16>, vector<256x128xf32> -> vector<256x128xf32>
    %c0_7 = arith.constant 0 : index
    %c0_8 = arith.constant 0 : index
    %c0_9 = arith.constant 0 : index
    %7 = vector.load %arg3[%c0_7, %c0_8, %c0_9] : memref<4x1x128xf32, #tpu.memory_space<vmem>>, vector<1x1x128xf32>
    %8 = vector.shape_cast %7 : vector<1x1x128xf32> to vector<1x128xf32>
    %9 = vector.broadcast %8 : vector<1x128xf32> to vector<256x128xf32>
    %10 = arith.addf %6, %9 : vector<256x128xf32>
    %cst_10 = arith.constant 0.000000e+00 : f32
    %11 = vector.broadcast %cst_10 : f32 to vector<256x128xf32>
    %12 = arith.maximumf %10, %11 : vector<256x128xf32>
    %13 = arith.truncf %12 : vector<256x128xf32> to vector<256x128xbf16>
    %c0_11 = arith.constant 0 : index
    %c0_12 = arith.constant 0 : index
    %14 = vector.load %arg0[%c0_11, %c0_12] : memref<256x256xbf16, #tpu.memory_space<vmem>>, vector<256x256xbf16>
    %cst_13 = arith.constant dense<0.000000e+00> : vector<256x128xf32>
    %15 = tpu.matmul %14, %13, %cst_13 {dimension_numbers = #tpu.dot_dimension_numbers<[1], [0], [0], [1], [0, 0, 1, 1], [], []>} : vector<256x256xbf16>, vector<256x128xbf16>, vector<256x128xf32> -> vector<256x128xf32>
    %16 = arith.truncf %15 : vector<256x128xf32> to vector<256x128xbf16>
    %c1 = arith.constant 1 : index
    %c0_14 = arith.constant 0 : index
    %c0_15 = arith.constant 0 : index
    %17 = vector.load %arg2[%c1, %c0_14, %c0_15] : memref<4x128x128xbf16, #tpu.memory_space<vmem>>, vector<1x128x128xbf16>
    %18 = vector.shape_cast %17 : vector<1x128x128xbf16> to vector<128x128xbf16>
    %cst_16 = arith.constant dense<0.000000e+00> : vector<256x128xf32>
    %19 = tpu.matmul %16, %18, %cst_16 {dimension_numbers = #tpu.dot_dimension_numbers<[1], [0], [0], [1], [0, 0, 1, 1], [], []>} : vector<256x128xbf16>, vector<128x128xbf16>, vector<256x128xf32> -> vector<256x128xf32>
    %c1_17 = arith.constant 1 : index
    %c0_18 = arith.constant 0 : index
    %c0_19 = arith.constant 0 : index
    %20 = vector.load %arg3[%c1_17, %c0_18, %c0_19] : memref<4x1x128xf32, #tpu.memory_space<vmem>>, vector<1x1x128xf32>
    %21 = vector.shape_cast %20 : vector<1x1x128xf32> to vector<1x128xf32>
    %22 = vector.broadcast %21 : vector<1x128xf32> to vector<256x128xf32>
    %23 = arith.addf %19, %22 : vector<256x128xf32>
    %cst_20 = arith.constant 0.000000e+00 : f32
    %24 = vector.broadcast %cst_20 : f32 to vector<256x128xf32>
    %25 = arith.maximumf %23, %24 : vector<256x128xf32>
    %26 = arith.truncf %25 : vector<256x128xf32> to vector<256x128xbf16>
    %c0_21 = arith.constant 0 : index
    %c0_22 = arith.constant 0 : index
    %27 = vector.load %arg0[%c0_21, %c0_22] : memref<256x256xbf16, #tpu.memory_space<vmem>>, vector<256x256xbf16>
    %cst_23 = arith.constant dense<0.000000e+00> : vector<256x128xf32>
    %28 = tpu.matmul %27, %26, %cst_23 {dimension_numbers = #tpu.dot_dimension_numbers<[1], [0], [0], [1], [0, 0, 1, 1], [], []>} : vector<256x256xbf16>, vector<256x128xbf16>, vector<256x128xf32> -> vector<256x128xf32>
    %29 = arith.truncf %28 : vector<256x128xf32> to vector<256x128xbf16>
    %c2 = arith.constant 2 : index
    %c0_24 = arith.constant 0 : index
    %c0_25 = arith.constant 0 : index
    %30 = vector.load %arg2[%c2, %c0_24, %c0_25] : memref<4x128x128xbf16, #tpu.memory_space<vmem>>, vector<1x128x128xbf16>
    %31 = vector.shape_cast %30 : vector<1x128x128xbf16> to vector<128x128xbf16>
    %cst_26 = arith.constant dense<0.000000e+00> : vector<256x128xf32>
    %32 = tpu.matmul %29, %31, %cst_26 {dimension_numbers = #tpu.dot_dimension_numbers<[1], [0], [0], [1], [0, 0, 1, 1], [], []>} : vector<256x128xbf16>, vector<128x128xbf16>, vector<256x128xf32> -> vector<256x128xf32>
    %c2_27 = arith.constant 2 : index
    %c0_28 = arith.constant 0 : index
    %c0_29 = arith.constant 0 : index
    %33 = vector.load %arg3[%c2_27, %c0_28, %c0_29] : memref<4x1x128xf32, #tpu.memory_space<vmem>>, vector<1x1x128xf32>
    %34 = vector.shape_cast %33 : vector<1x1x128xf32> to vector<1x128xf32>
    %35 = vector.broadcast %34 : vector<1x128xf32> to vector<256x128xf32>
    %36 = arith.addf %32, %35 : vector<256x128xf32>
    %cst_30 = arith.constant 0.000000e+00 : f32
    %37 = vector.broadcast %cst_30 : f32 to vector<256x128xf32>
    %38 = arith.maximumf %36, %37 : vector<256x128xf32>
    %39 = arith.truncf %38 : vector<256x128xf32> to vector<256x128xbf16>
    %c0_31 = arith.constant 0 : index
    %c0_32 = arith.constant 0 : index
    %40 = vector.load %arg0[%c0_31, %c0_32] : memref<256x256xbf16, #tpu.memory_space<vmem>>, vector<256x256xbf16>
    %cst_33 = arith.constant dense<0.000000e+00> : vector<256x128xf32>
    %41 = tpu.matmul %40, %39, %cst_33 {dimension_numbers = #tpu.dot_dimension_numbers<[1], [0], [0], [1], [0, 0, 1, 1], [], []>} : vector<256x256xbf16>, vector<256x128xbf16>, vector<256x128xf32> -> vector<256x128xf32>
    %42 = arith.truncf %41 : vector<256x128xf32> to vector<256x128xbf16>
    %c3 = arith.constant 3 : index
    %c0_34 = arith.constant 0 : index
    %c0_35 = arith.constant 0 : index
    %43 = vector.load %arg2[%c3, %c0_34, %c0_35] : memref<4x128x128xbf16, #tpu.memory_space<vmem>>, vector<1x128x128xbf16>
    %44 = vector.shape_cast %43 : vector<1x128x128xbf16> to vector<128x128xbf16>
    %cst_36 = arith.constant dense<0.000000e+00> : vector<256x128xf32>
    %45 = tpu.matmul %42, %44, %cst_36 {dimension_numbers = #tpu.dot_dimension_numbers<[1], [0], [0], [1], [0, 0, 1, 1], [], []>} : vector<256x128xbf16>, vector<128x128xbf16>, vector<256x128xf32> -> vector<256x128xf32>
    %c3_37 = arith.constant 3 : index
    %c0_38 = arith.constant 0 : index
    %c0_39 = arith.constant 0 : index
    %46 = vector.load %arg3[%c3_37, %c0_38, %c0_39] : memref<4x1x128xf32, #tpu.memory_space<vmem>>, vector<1x1x128xf32>
    %47 = vector.shape_cast %46 : vector<1x1x128xf32> to vector<1x128xf32>
    %48 = vector.broadcast %47 : vector<1x128xf32> to vector<256x128xf32>
    %49 = arith.addf %45, %48 : vector<256x128xf32>
    %c0_40 = arith.constant 0 : index
    %c0_41 = arith.constant 0 : index
    %50 = vector.load %arg4[%c0_40, %c0_41] : memref<256x128xf32, #tpu.memory_space<vmem>>, vector<256x128xf32>
    tpu.vector_store %arg4[%c0_40, %c0_41], %49 {strides = array<i32>} : memref<256x128xf32, #tpu.memory_space<vmem>>, vector<256x128xf32>,
    return
  }
}

</mosaic_0001>

<bundles_post_ra>
// kernel: gcn_deep_forward.1
= control target key start
LH: loop header
LB: loop body
LE: loop exit
PB: predicated region body
PF: predicated region fallthrough
CT: control target
= control target key end

     0   :  { %s4104_s1 = inlined_call_operand.vmem [shape: bf16[256,128], index: 1, kind: input, shape index: {}]   ;;  %s4105_s0 = inlined_call_operand.vmem [shape: bf16[256,256], index: 0, kind: input, shape index: {}]   ;;  %s4106_s2 = inlined_call_operand.vmem [shape: bf16[4,128,128], index: 2, kind: input, shape index: {}]   ;;  %s4107_s3 = inlined_call_operand.vmem [shape: f32[4,1,128], index: 3, kind: input, shape index: {}]   ;;  %s4108_s4 = inlined_call_operand.vmem [shape: f32[256,128], index: 4, kind: output, shape index: {}]  }
   0x1   :  { %v3031_v0 = vld [vmem:[%s4104_s1 + $0x78] sm:$0xff]   ;;  %v3033_v2 = vld [vmem:[%s4104_s1 + $0x70] sm:$0xff]   ;;  %v3035_v4 = vld [vmem:[%s4104_s1 + $0x68] sm:$0xff]  }
   0x2   :  { %v3032_v1 = vld [vmem:[%s4104_s1 + $0x38] sm:$0xff]   ;;  %2295 = vmatprep.subr.bf16.mxu0 %v3031_v0  ;;  %v3034_v3 = vld [vmem:[%s4104_s1 + $0x30] sm:$0xff]   ;;  %v3036_v5 = vld [vmem:[%s4104_s1 + $0x28] sm:$0xff]  }
   0x3   :  { %2296 = vmatpush3.bf16.msra.mxu0 %v3032_v1  ;;  %v3037_v6 = vld [vmem:[%s4104_s1 + $0x60] sm:$0xff]   ;;  %v3039_v8 = vld [vmem:[%s4104_s1 + $0x58] sm:$0xff]   ;;  %v3041_v10 = vld [vmem:[%s4104_s1 + $0x50] sm:$0xff]  }
   0x4   :  { %2297 = vmatprep.subr.bf16.mxu0 %v3033_v2  ;;  %v3038_v7 = vld [vmem:[%s4104_s1 + $0x20] sm:$0xff]   ;;  %v3040_v9 = vld [vmem:[%s4104_s1 + $0x18] sm:$0xff]   ;;  %v3042_v12 = vld [vmem:[%s4104_s1 + $0x10] sm:$0xff]  }
   0x5   :  { %v3220_v11 = vld [vmem:[%s4105_s0 + $0x4] ss:$8 sps:$4 sm:$0xff]   ;;  %v3241_v17 = vld [vmem:[%s4105_s0] ss:$8 sps:$4 sm:$0xff]   ;;  %v3246_v18 = vld [vmem:[%s4105_s0 + $0x14] ss:$8 sps:$4 sm:$0xff]  }
   0x6   :  { %370 = vmatprep.mubr.bf16.mxu0 %v3220_v11  ;;  %v3043_v13 = vld [vmem:[%s4104_s1 + $0x48] sm:$0xff]   ;;  %v3045_v15 = vld [vmem:[%s4104_s1 + $0x40] sm:$0xff]   ;;  %v3253_v19 = vld [vmem:[%s4105_s0 + $0x10] ss:$8 sps:$4 sm:$0xff]  }
   0x7   :  { %2298 = vmatpush3.bf16.msra.mxu0 %v3034_v3  ;;  %v3044_v14 = vld [vmem:[%s4104_s1 + $0x8] sm:$0xff]   ;;  %v3046_v16 = vld [vmem:[%s4104_s1] sm:$0xff]   ;;  %v3095_v21 = vld [vmem:[%s4106_s2 + $0x38] sm:$0xff]  }
   0x8   :  { %2299 = vmatprep.subr.bf16.mxu0 %v3035_v4  ;;  %v3258_v20 = vld [vmem:[%s4105_s0 + $0x24] ss:$8 sps:$4 sm:$0xff]   ;;  %v3096_v22 = vld [vmem:[%s4106_s2 + $0x30] sm:$0xff]   ;;  %2839 = vmatprep.subr.bf16.mxu1 %v3095_v21  ;;  %v3274_v24 = vld [vmem:[%s4105_s0 + $0x20] ss:$8 sps:$4 sm:$0xff]  }
   0x9   :  { %2840 = vmatpush3.bf16.msra.mxu1 %v3095_v21  ;;  %v3097_v23 = vld [vmem:[%s4106_s2 + $0x28] sm:$0xff]   ;;  %v3098_v25 = vld [vmem:[%s4106_s2 + $0x20] sm:$0xff]   ;;  %v3282_v26 = vld [vmem:[%s4105_s0 + $0x34] ss:$8 sps:$4 sm:$0xff]  }
   0xa   :  { %2841 = vmatprep.subr.bf16.mxu1 %v3096_v22  ;;  %v3289_v27 = vld [vmem:[%s4105_s0 + $0x30] ss:$8 sps:$4 sm:$0xff]   ;;  %v3294_v28 = vld [vmem:[%s4105_s0 + $0x44] ss:$8 sps:$4 sm:$0xff]   ;;  %v3301_v29 = vld [vmem:[%s4105_s0 + $0x40] ss:$8 sps:$4 sm:$0xff]  }
   0xb   :  { %2300 = vmatpush3.bf16.msra.mxu0 %v3036_v5  ;;  %v3306_v30 = vld [vmem:[%s4105_s0 + $0x54] ss:$8 sps:$4 sm:$0xff]   ;;  %v3313_v31 = vld [vmem:[%s4105_s0 + $0x50] ss:$8 sps:$4 sm:$0xff]   ;;  %v3318_v32 = vld [vmem:[%s4105_s0 + $0x64] ss:$8 sps:$4 sm:$0xff]  }
   0xc   :  { %2301 = vmatprep.subr.bf16.mxu0 %v3037_v6  ;;  %v3325_v33 = vld [vmem:[%s4105_s0 + $0x60] ss:$8 sps:$4 sm:$0xff]   ;;  %v3330_v34 = vld [vmem:[%s4105_s0 + $0x74] ss:$8 sps:$4 sm:$0xff]   ;;  %v3337_v35 = vld [vmem:[%s4105_s0 + $0x70] ss:$8 sps:$4 sm:$0xff]  }
   0xd   :  { %2842 = vmatpush3.bf16.msra.mxu1 %v3096_v22  ;;  %v3342_v36 = vld [vmem:[%s4105_s0 + $0x84] ss:$8 sps:$4 sm:$0xff]   ;;  %v3349_v37 = vld [vmem:[%s4105_s0 + $0x80] ss:$8 sps:$4 sm:$0xff]   ;;  %v3354_v38 = vld [vmem:[%s4105_s0 + $0x94] ss:$8 sps:$4 sm:$0xff]  }
   0xe   :  { %2843 = vmatprep.subr.bf16.mxu1 %v3097_v23  ;;  %v3099_v39 = vld [vmem:[%s4106_s2 + $0x18] sm:$0xff]   ;;  %v3369_v41 = vld [vmem:[%s4105_s0 + $0xa4] ss:$8 sps:$4 sm:$0xff]   ;;  %v3100_v42 = vld [vmem:[%s4106_s2 + $0x10] sm:$0xff]  }
   0xf   :  { %2302 = vmatpush3.bf16.msra.mxu0 %v3038_v7  ;;  %v3364_v40 = vld [vmem:[%s4105_s0 + $0x90] ss:$8 sps:$4 sm:$0xff]   ;;  %4134 = vst [vmem:[#allocation3_spill] sm:$0xff] %v3369_v41  ;;  %v3101_v43 = vld [vmem:[%s4106_s2 + $0x8] sm:$0xff]   ;;  %v3387_v45 = vld [vmem:[%s4105_s0 + $0xb4] ss:$8 sps:$4 sm:$0xff]  }
  0x10   :  { %2303 = vmatprep.subr.bf16.mxu0 %v3039_v8  ;;  %4133 = vst [vmem:[#allocation2_spill] sm:$0xff] %v3364_v40  ;;  %v3382_v44 = vld [vmem:[%s4105_s0 + $0xa0] ss:$8 sps:$4 sm:$0xff]   ;;  %4136 = vst [vmem:[#allocation5_spill] sm:$0xff] %v3387_v45  ;;  %v3397_v47 = vld [vmem:[%s4105_s0 + $0xb0] ss:$8 sps:$4 sm:$0xff]  }
  0x11   :  { %2844 = vmatpush3.bf16.msra.mxu1 %v3097_v23  ;;  %4135 = vst [vmem:[#allocation4_spill] sm:$0xff] %v3382_v44  ;;  %v3102_v46 = vld [vmem:[%s4106_s2] sm:$0xff]   ;;  %4137 = vst [vmem:[#allocation6_spill] sm:$0xff] %v3397_v47  ;;  %v3414_v50 = vld [vmem:[%s4105_s0 + $0xd4] ss:$8 sps:$4 sm:$0xff]  }
  0x12   :  { %2845 = vmatprep.subr.bf16.mxu1 %v3098_v25  ;;  %v3402_v48 = vld [vmem:[%s4105_s0 + $0xc4] ss:$8 sps:$4 sm:$0xff]   ;;  %v3409_v49 = vld [vmem:[%s4105_s0 + $0xc0] ss:$8 sps:$4 sm:$0xff]   ;;  %4140 = vst [vmem:[#allocation9_spill] sm:$0xff] %v3414_v50 }
  0x13   :  { %2304 = vmatpush3.bf16.msra.mxu0 %v3040_v9  ;;  %4138 = vst [vmem:[#allocation7_spill] sm:$0xff] %v3402_v48  ;;  %4139 = vst [vmem:[#allocation8_spill] sm:$0xff] %v3409_v49  ;;  %v3421_v51 = vld [vmem:[%s4105_s0 + $0xd0] ss:$8 sps:$4 sm:$0xff]   ;;  %v3426_v52 = vld [vmem:[%s4105_s0 + $0xe4] ss:$8 sps:$4 sm:$0xff]  }
  0x14   :  { %2305 = vmatprep.subr.bf16.mxu0 %v3041_v10  ;;  %4141 = vst [vmem:[#allocation10_spill] sm:$0xff] %v3421_v51  ;;  %4142 = vst [vmem:[#allocation11_spill] sm:$0xff] %v3426_v52  ;;  %v3433_v53 = vld [vmem:[%s4105_s0 + $0xe0] ss:$8 sps:$4 sm:$0xff]   ;;  %v3438_v54 = vld [vmem:[%s4105_s0 + $0xf4] ss:$8 sps:$4 sm:$0xff]  }
  0x15   :  { %2846 = vmatpush3.bf16.msra.mxu1 %v3098_v25  ;;  %4143 = vst [vmem:[#allocation12_spill] sm:$0xff] %v3433_v53  ;;  %4144 = vst [vmem:[#allocation13_spill] sm:$0xff] %v3438_v54  ;;  %v3445_v55 = vld [vmem:[%s4105_s0 + $0xf0] ss:$8 sps:$4 sm:$0xff]  }
  0x16   :  { %2847 = vmatprep.subr.bf16.mxu1 %v3099_v39  ;;  %4145 = vst [vmem:[#allocation14_spill] sm:$0xff] %v3445_v55 }
  0x17   :  { %2306 = vmatpush3.bf16.msra.mxu0 %v3042_v12 }
  0x18   :  { %2307 = vmatprep.subr.bf16.mxu0 %v3043_v13 }
  0x19   :  { %2848 = vmatpush3.bf16.msra.mxu1 %v3099_v39 }
  0x1a   :  { %2849 = vmatprep.subr.bf16.mxu1 %v3100_v42 }
  0x1b   :  { %2308 = vmatpush3.bf16.msra.mxu0 %v3044_v14 }
  0x1c   :  { %2309 = vmatprep.subr.bf16.mxu0 %v3045_v15 }
  0x1d   :  { %2850 = vmatpush3.bf16.msra.mxu1 %v3100_v42 }
  0x1e   :  { %2851 = vmatprep.subr.bf16.mxu1 %v3101_v43 }
  0x1f   :  { %2310 = vmatpush3.bf16.msra.mxu0 %v3046_v16 }
  0x21   :  { %2852 = vmatpush3.bf16.msra.mxu1 %v3101_v43 }
  0x22   :  { %371 = vmatmul.mubr.bf16.vlgmr.msra.gmra.mxu0 %v3241_v17  ;;  %2853 = vmatprep.subr.bf16.mxu1 %v3102_v46 }
  0x23   :  { %378 = vmatprep.mubr.bf16.mxu0 %v3246_v18 }
  0x25   :  { %2854 = vmatpush3.bf16.msra.mxu1 %v3102_v46 }
  0x2a   :  { %379 = vmatmul.mubr.bf16.gmra.mxu0 %v3253_v19 }
  0x2b   :  { %386 = vmatprep.mubr.bf16.mxu0 %v3258_v20 }
  0x32   :  { %387 = vmatmul.mubr.bf16.gmra.mxu0 %v3274_v24 }
  0x33   :  { %394 = vmatprep.mubr.bf16.mxu0 %v3282_v26 }
  0x3a   :  { %395 = vmatmul.mubr.bf16.gmra.mxu0 %v3289_v27 }
  0x3b   :  { %402 = vmatprep.mubr.bf16.mxu0 %v3294_v28 }
  0x42   :  { %403 = vmatmul.mubr.bf16.gmra.mxu0 %v3301_v29 }
  0x43   :  { %410 = vmatprep.mubr.bf16.mxu0 %v3306_v30 }
  0x4a   :  { %411 = vmatmul.mubr.bf16.gmra.mxu0 %v3313_v31 }
  0x4b   :  { %418 = vmatprep.mubr.bf16.mxu0 %v3318_v32 }
  0x52   :  { %419 = vmatmul.mubr.bf16.gmra.mxu0 %v3325_v33 }
  0x53   :  { %426 = vmatprep.mubr.bf16.mxu0 %v3330_v34 }
  0x5a   :  { %427 = vmatmul.mubr.bf16.gmra.mxu0 %v3337_v35 }
  0x5b   :  { %434 = vmatprep.mubr.bf16.mxu0 %v3342_v36 }
  0x62   :  { %435 = vmatmul.mubr.bf16.gmra.mxu0 %v3349_v37 }
  0x63   :  { %442 = vmatprep.mubr.bf16.mxu0 %v3354_v38 }
  0x6a   :  { %443 = vmatmul.mubr.bf16.gmra.mxu0 %v3364_v40 }
  0x6b   :  { %450 = vmatprep.mubr.bf16.mxu0 %v3369_v41 }
  0x72   :  { %451 = vmatmul.mubr.bf16.gmra.mxu0 %v3382_v44 }
  0x73   :  { %458 = vmatprep.mubr.bf16.mxu0 %v3387_v45 }
  0x7a   :  { %459 = vmatmul.mubr.bf16.gmra.mxu0 %v3397_v47 }
  0x7b   :  { %466 = vmatprep.mubr.bf16.mxu0 %v3402_v48 }
  0x82   :  { %467 = vmatmul.mubr.bf16.gmra.mxu0 %v3409_v49 }
  0x83   :  { %474 = vmatprep.mubr.bf16.mxu0 %v3414_v50 }
  0x8a   :  { %475 = vmatmul.mubr.bf16.gmra.mxu0 %v3421_v51 }
  0x8b   :  { %482 = vmatprep.mubr.bf16.mxu0 %v3426_v52 }
  0x92   :  { %483 = vmatmul.mubr.bf16.gmra.mxu0 %v3433_v53 }
  0x93   :  { %490 = vmatprep.mubr.bf16.mxu0 %v3438_v54 }
  0x9a   :  { %491 = vmatmul.mubr.bf16.gmra.mxu0 %v3445_v55 }
  0xe2   :  { %v2311_v56 = vpop.f32.mrf.mxu0 }
  0xe4   :  { %v2312_v57 = vpop.f32.mrf.mxu0 }
  0xe5   :  { %v2313_v60 = vadd.f32 %v2312_v57, %v2311_v56 }
  0xe6   :  { %v2314_v58 = vpop.f32.mrf.mxu0 }
  0xe8   :  { %v2315_v59 = vpop.f32.mrf.mxu0 }
  0xe9   :  { %v2316_v61 = vadd.f32 %v2315_v59, %v2314_v58 }
  0xea   :  { %v2317_v62 = vpop.f32.mrf.mxu0 }
  0xeb   :  { %v499_v63 = vpack.c.bf16 %v2316_v61, %v2313_v60 }
  0xec   :  { %v2318_v0 = vpop.f32.mrf.mxu0 }
  0xed   :  { %2855 = vmatprep.mubr.bf16.mxu1 %v499_v63  ;;  %v2319_v3 = vadd.f32 %v2318_v0, %v2317_v62 }
  0xee   :  { %v2320_v1 = vpop.f32.mrf.mxu0 }
  0xf0   :  { %v2321_v2 = vpop.f32.mrf.mxu0 }
  0xf1   :  { %v2322_v4 = vadd.f32 %v2321_v2, %v2320_v1 }
  0xf2   :  { %v2323_v5 = vpop.f32.mrf.mxu0 }
  0xf3   :  { %v500_v6 = vpack.c.bf16 %v2322_v4, %v2319_v3 }
  0xf4   :  { %v2324_v7 = vpop.f32.mrf.mxu0 }
  0xf5   :  { %2856 = vmatmul.mubr.bf16.vlgmr.msra.gmra.mxu1 %v500_v6  ;;  %v2325_v10 = vadd.f32 %v2324_v7, %v2323_v5 }
  0xf6   :  { %v2326_v8 = vpop.f32.mrf.mxu0 }
  0xf8   :  { %v2327_v9 = vpop.f32.mrf.mxu0 }
  0xf9   :  { %v2328_v12 = vadd.f32 %v2327_v9, %v2326_v8 }
  0xfa   :  { %v2329_v13 = vpop.f32.mrf.mxu0 }
  0xfb   :  { %v501_v14 = vpack.c.bf16 %v2328_v12, %v2325_v10 }
  0xfc   :  { %v2330_v15 = vpop.f32.mrf.mxu0 }
  0xfd   :  { %2859 = vmatprep.mubr.bf16.mxu1 %v501_v14  ;;  %v2331_v22 = vadd.f32 %v2330_v15, %v2329_v13 }
  0xfe   :  { %v2332_v16 = vpop.f32.mrf.mxu0 }
 0x100   :  { %v2333_v21 = vpop.f32.mrf.mxu0 }
 0x101   :  { %v2334_v23 = vadd.f32 %v2333_v21, %v2332_v16 }
 0x102   :  { %v2335_v25 = vpop.f32.mrf.mxu0 }
 0x103   :  { %v502_v39 = vpack.c.bf16 %v2334_v23, %v2331_v22 }
 0x104   :  { %v2336_v42 = vpop.f32.mrf.mxu0 }
 0x105   :  { %2860 = vmatmul.mubr.bf16.gmra.mxu1 %v502_v39  ;;  %v2337_v56 = vadd.f32 %v2336_v42, %v2335_v25 }
 0x106   :  { %v2338_v43 = vpop.f32.mrf.mxu0 }
 0x108   :  { %v2339_v46 = vpop.f32.mrf.mxu0 }
 0x109   :  { %v2340_v57 = vadd.f32 %v2339_v46, %v2338_v43 }
 0x10a   :  { %v2341_v58 = vpop.f32.mrf.mxu0 }
 0x10b   :  { %v503_v59 = vpack.c.bf16 %v2340_v57, %v2337_v56 }
 0x10c   :  { %v2342_v60 = vpop.f32.mrf.mxu0 }
 0x10d   :  { %2863 = vmatprep.mubr.bf16.mxu1 %v503_v59  ;;  %v2343_v63 = vadd.f32 %v2342_v60, %v2341_v58 }
 0x10e   :  { %v2344_v61 = vpop.f32.mrf.mxu0 }
 0x110   :  { %v2345_v62 = vpop.f32.mrf.mxu0 }
 0x111   :  { %v2346_v0 = vadd.f32 %v2345_v62, %v2344_v61 }
 0x112   :  { %v2347_v1 = vpop.f32.mrf.mxu0 }
 0x113   :  { %v504_v2 = vpack.c.bf16 %v2346_v0, %v2343_v63 }
 0x114   :  { %v2348_v3 = vpop.f32.mrf.mxu0 }
 0x115   :  { %2864 = vmatmul.mubr.bf16.gmra.mxu1 %v504_v2  ;;  %v2349_v6 = vadd.f32 %v2348_v3, %v2347_v1 }
 0x116   :  { %v2350_v4 = vpop.f32.mrf.mxu0 }
 0x118   :  { %v2351_v5 = vpop.f32.mrf.mxu0 }
 0x119   :  { %v2352_v7 = vadd.f32 %v2351_v5, %v2350_v4 }
 0x11a   :  { %v2353_v8 = vpop.f32.mrf.mxu0 }
 0x11b   :  { %v505_v9 = vpack.c.bf16 %v2352_v7, %v2349_v6 }
 0x11c   :  { %v2354_v10 = vpop.f32.mrf.mxu0 }
 0x11d   :  { %2867 = vmatprep.mubr.bf16.mxu1 %v505_v9  ;;  %v2355_v14 = vadd.f32 %v2354_v10, %v2353_v8 }
 0x11e   :  { %v2356_v12 = vpop.f32.mrf.mxu0 }
 0x120   :  { %v2357_v13 = vpop.f32.mrf.mxu0 }
 0x121   :  { %v2358_v15 = vadd.f32 %v2357_v13, %v2356_v12 }
 0x122   :  { %v2359_v16 = vpop.f32.mrf.mxu0 }
 0x123   :  { %v506_v21 = vpack.c.bf16 %v2358_v15, %v2355_v14 }
 0x124   :  { %v2360_v22 = vpop.f32.mrf.mxu0 }
 0x125   :  { %2868 = vmatmul.mubr.bf16.gmra.mxu1 %v506_v21  ;;  %v2361_v39 = vadd.f32 %v2360_v22, %v2359_v16 }
 0x126   :  { %v2362_v23 = vpop.f32.mrf.mxu0 }
 0x128   :  { %v2363_v25 = vpop.f32.mrf.mxu0 }
 0x129   :  { %v2364_v42 = vadd.f32 %v2363_v25, %v2362_v23 }
 0x12a   :  { %v2365_v43 = vpop.f32.mrf.mxu0 }
 0x12b   :  { %v507_v46 = vpack.c.bf16 %v2364_v42, %v2361_v39 }
 0x12c   :  { %v2366_v56 = vpop.f32.mrf.mxu0 }
 0x12d   :  { %2871 = vmatprep.mubr.bf16.mxu1 %v507_v46  ;;  %v2367_v59 = vadd.f32 %v2366_v56, %v2365_v43 }
 0x12e   :  { %v2368_v57 = vpop.f32.mrf.mxu0 }
 0x130   :  { %v2369_v58 = vpop.f32.mrf.mxu0 }
 0x131   :  { %v2370_v60 = vadd.f32 %v2369_v58, %v2368_v57 }
 0x132   :  { %v2371_v61 = vpop.f32.mrf.mxu0 }
 0x133   :  { %v508_v62 = vpack.c.bf16 %v2370_v60, %v2367_v59 }
 0x134   :  { %v2372_v63 = vpop.f32.mrf.mxu0 }
 0x135   :  { %2872 = vmatmul.mubr.bf16.gmra.mxu1 %v508_v62  ;;  %v2373_v2 = vadd.f32 %v2372_v63, %v2371_v61 }
 0x136   :  { %v2374_v0 = vpop.f32.mrf.mxu0 }
 0x138   :  { %v2375_v1 = vpop.f32.mrf.mxu0 }
 0x139   :  { %v2376_v3 = vadd.f32 %v2375_v1, %v2374_v0 }
 0x13a   :  { %v2377_v4 = vpop.f32.mrf.mxu0 }
 0x13b   :  { %v509_v5 = vpack.c.bf16 %v2376_v3, %v2373_v2 }
 0x13c   :  { %v2378_v6 = vpop.f32.mrf.mxu0 }
 0x13d   :  { %2875 = vmatprep.mubr.bf16.mxu1 %v509_v5  ;;  %v2379_v9 = vadd.f32 %v2378_v6, %v2377_v4 }
 0x13e   :  { %v2380_v7 = vpop.f32.mrf.mxu0 }
 0x140   :  { %v2381_v8 = vpop.f32.mrf.mxu0 }
 0x141   :  { %v2382_v10 = vadd.f32 %v2381_v8, %v2380_v7 }
 0x142   :  { %v2383_v12 = vpop.f32.mrf.mxu0 }
 0x143   :  { %v510_v13 = vpack.c.bf16 %v2382_v10, %v2379_v9  ;;  %v3452_v9 = vld [vmem:[%s4107_s3] ss:$0 sm:$0xff] }
 0x144   :  { %v2384_v14 = vpop.f32.mrf.mxu0 }
 0x145   :  { %2876 = vmatmul.mubr.bf16.gmra.mxu1 %v510_v13  ;;  %v2385_v21 = vadd.f32 %v2384_v14, %v2383_v12 }
 0x146   :  { %v2386_v15 = vpop.f32.mrf.mxu0 }
 0x148   :  { %v2387_v16 = vpop.f32.mrf.mxu0 }
 0x149   :  { %v2388_v22 = vadd.f32 %v2387_v16, %v2386_v15 }
 0x14a   :  { %v2389_v23 = vpop.f32.mrf.mxu0 }
 0x14b   :  { %v511_v25 = vpack.c.bf16 %v2388_v22, %v2385_v21 }
 0x14c   :  { %v2390_v39 = vpop.f32.mrf.mxu0 }
 0x14d   :  { %2879 = vmatprep.mubr.bf16.mxu1 %v511_v25  ;;  %v2391_v46 = vadd.f32 %v2390_v39, %v2389_v23 }
 0x14e   :  { %v2392_v42 = vpop.f32.mrf.mxu0 }
 0x150   :  { %v2393_v43 = vpop.f32.mrf.mxu0 }
 0x151   :  { %v2394_v56 = vadd.f32 %v2393_v43, %v2392_v42 }
 0x152   :  { %v2395_v57 = vpop.f32.mrf.mxu0 }
 0x153   :  { %v512_v58 = vpack.c.bf16 %v2394_v56, %v2391_v46 }
 0x154   :  { %v2396_v59 = vpop.f32.mrf.mxu0 }
 0x155   :  { %2880 = vmatmul.mubr.bf16.gmra.mxu1 %v512_v58  ;;  %v2397_v62 = vadd.f32 %v2396_v59, %v2395_v57 }
 0x156   :  { %v2398_v60 = vpop.f32.mrf.mxu0 }
 0x158   :  { %v2399_v61 = vpop.f32.mrf.mxu0 }
 0x159   :  { %v2400_v63 = vadd.f32 %v2399_v61, %v2398_v60 }
 0x15a   :  { %v2401_v0 = vpop.f32.mrf.mxu0 }
 0x15b   :  { %v513_v1 = vpack.c.bf16 %v2400_v63, %v2397_v62 }
 0x15c   :  { %v2402_v2 = vpop.f32.mrf.mxu0 }
 0x15d   :  { %2883 = vmatprep.mubr.bf16.mxu1 %v513_v1  ;;  %v2403_v5 = vadd.f32 %v2402_v2, %v2401_v0 }
 0x15e   :  { %v2404_v3 = vpop.f32.mrf.mxu0 }
 0x160   :  { %v2405_v4 = vpop.f32.mrf.mxu0 }
 0x161   :  { %v2406_v6 = vadd.f32 %v2405_v4, %v2404_v3 }
 0x163   :  { %v514_v7 = vpack.c.bf16 %v2406_v6, %v2403_v5 }
 0x165   :  { %2884 = vmatmul.mubr.bf16.gmra.mxu1 %v514_v7 }
 0x166   :  { %827 = vmatprep.mubr.bf16.mxu1 %v3220_v11 }
 0x1b5   :  { %v2857_v8 = vpop.f32.mrf.mxu1 }
 0x1b6   :  { %v629_v12 = vadd.f32 %v2857_v8, %v3452_v9 }
 0x1b7   :  { %v3454_v10 = vpop.f32.mrf.mxu1 }
 0x1b8   :  { %v749_v15 = vmax.f32 %v629_v12, 0.0 }
 0x1b9   :  { %v2858_v13 = vpop.f32.mrf.mxu1 }
 0x1ba   :  { %v632_v14 = vadd.f32 %v2858_v13, %v3452_v9 }
 0x1bb   :  { %v3460_v22 = vpop.f32.mrf.mxu1 }
 0x1bc   :  { %v750_v16 = vmax.f32 %v632_v14, 0.0 }
 0x1be   :  { %v3458_v21 = vpack.c.bf16 %v750_v16, %v749_v15 }
 0x1c5   :  { %v2861_v11 = vpop.f32.mrf.mxu1 }
 0x1c6   :  { %v645_v25 = vadd.f32 %v2861_v11, %v3452_v9 }
 0x1c7   :  { %v3462_v23 = vpop.f32.mrf.mxu1 }
 0x1c8   :  { %v753_v43 = vmax.f32 %v645_v25, 0.0 }
 0x1c9   :  { %v2862_v39 = vpop.f32.mrf.mxu1 }
 0x1ca   :  { %v648_v42 = vadd.f32 %v2862_v39, %v3452_v9 }
 0x1cb   :  { %v3468_v57 = vpop.f32.mrf.mxu1 }
 0x1cc   :  { %v754_v46 = vmax.f32 %v648_v42, 0.0 }
 0x1ce   :  { %v3466_v56 = vpack.c.bf16 %v754_v46, %v753_v43 }
 0x1d5   :  { %v2865_v58 = vpop.f32.mrf.mxu1 }
 0x1d7   :  { %v652_v59 = vpop.f32.mrf.mxu1 }
 0x1d9   :  { %v2866_v60 = vpop.f32.mrf.mxu1 }
 0x1db   :  { %v655_v61 = vpop.f32.mrf.mxu1 }
 0x1e5   :  { %v2869_v62 = vpop.f32.mrf.mxu1 }
 0x1e6   :  { %v677_v43 = vadd.f32 %v2869_v62, %v3452_v9 }
 0x1e7   :  { %v668_v63 = vpop.f32.mrf.mxu1 }
 0x1e8   :  { %v761_v47 = vmax.f32 %v677_v43, 0.0 }
 0x1e9   :  { %v2870_v0 = vpop.f32.mrf.mxu1 }
 0x1ea   :  { %v680_v25 = vadd.f32 %v2870_v0, %v3452_v9 }
 0x1eb   :  { %v671_v1 = vpop.f32.mrf.mxu1 }
 0x1ec   :  { %v762_v53 = vmax.f32 %v680_v25, 0.0  ;;  %v672_v52 = vadd.f32 %v3452_v9, %v671_v1 }
 0x1ee   :  { %v786_v25 = vpack.c.bf16 %v762_v53, %v761_v47  ;;  %v760_v41 = vmax.f32 %v672_v52, 0.0 }
 0x1f5   :  { %v3470_v2 = vpop.f32.mrf.mxu1 }
 0x1f7   :  { %v3472_v3 = vpop.f32.mrf.mxu1 }
 0x1f9   :  { %v3474_v4 = vpop.f32.mrf.mxu1 }
 0x1fb   :  { %v3476_v5 = vpop.f32.mrf.mxu1 }
 0x205   :  { %v2877_v6 = vpop.f32.mrf.mxu1 }
 0x207   :  { %v700_v7 = vpop.f32.mrf.mxu1 }
 0x209   :  { %v2878_v8 = vpop.f32.mrf.mxu1 }
 0x20a   :  { %v712_v47 = vadd.f32 %v2878_v8, %v3452_v9  ;;  %v701_v8 = vadd.f32 %v3452_v9, %v700_v7 }
 0x20b   :  { %v703_v12 = vpop.f32.mrf.mxu1 }
 0x215   :  { %v2881_v13 = vpop.f32.mrf.mxu1 }
 0x216   :  { %v725_v62 = vadd.f32 %v2881_v13, %v3452_v9 }
 0x217   :  { %v716_v14 = vpop.f32.mrf.mxu1 }
 0x219   :  { %v2882_v15 = vpop.f32.mrf.mxu1 }
 0x21a   :  { %v728_v50 = vadd.f32 %v2882_v15, %v3452_v9 }
 0x21b   :  { %v719_v16 = vpop.f32.mrf.mxu1 }
 0x21c   :  { %v774_v1 = vmax.f32 %v728_v50, 0.0  ;;  %v720_v40 = vadd.f32 %v3452_v9, %v719_v16  ;;  %v704_v16 = vadd.f32 %v3452_v9, %v703_v12  ;;  %v693_v12 = vadd.f32 %v3470_v2, %v3452_v9 }
 0x21e   :  { %v772_v50 = vmax.f32 %v720_v40, 0.0  ;;  %v640_v40 = vadd.f32 %v3452_v9, %v3468_v57  ;;  %v688_v57 = vadd.f32 %v3452_v9, %v3476_v5 }
 0x220   :  { %v752_v7 = vmax.f32 %v640_v40, 0.0 }
 0x225   :  { %v2885_v11 = vpop.f32.mrf.mxu1 }
 0x226   :  { %v741_v42 = vadd.f32 %v2885_v11, %v3452_v9  ;;  %v669_v11 = vadd.f32 %v3452_v9, %v668_v63  ;;  %v717_v63 = vadd.f32 %v3452_v9, %v716_v14  ;;  %v770_v14 = vmax.f32 %v712_v47, 0.0 }
 0x227   :  { %v732_v39 = vpop.f32.mrf.mxu1 }
 0x228   :  { %v733_v55 = vadd.f32 %v3452_v9, %v732_v39  ;;  %v777_v49 = vmax.f32 %v741_v42, 0.0  ;;  %v773_v42 = vmax.f32 %v725_v62, 0.0  ;;  %v637_v62 = vadd.f32 %v3452_v9, %v3462_v23 }
 0x229   :  { %v2886_v46 = vpop.f32.mrf.mxu1  ;;  %v624_v23 = vadd.f32 %v3452_v9, %v3460_v22 }
 0x22a   :  { %v744_v54 = vadd.f32 %v2886_v46, %v3452_v9  ;;  %v775_v45 = vmax.f32 %v733_v55, 0.0  ;;  %v664_v46 = vadd.f32 %v2866_v60, %v3452_v9  ;;  %v792_v52 = vpack.c.bf16 %v774_v1, %v773_v42 }
 0x22b   :  { %v735_v51 = vpop.f32.mrf.mxu1  ;;  %v751_v1 = vmax.f32 %v637_v62, 0.0  ;;  %v621_v42 = vadd.f32 %v3452_v9, %v3454_v10  ;;  %v3106_v10 = vld [vmem:[%s4106_s2 + $0x60] sm:$0xff]  }
 0x22c   :  { %v778_v48 = vmax.f32 %v744_v54, 0.0  ;;  %v736_v0 = vadd.f32 %v3452_v9, %v735_v51  ;;  %v661_v54 = vadd.f32 %v2865_v58, %v3452_v9  ;;  %v759_v51 = vmax.f32 %v669_v11, 0.0 }
 0x22d   :  { %v758_v55 = vmax.f32 %v664_v46, 0.0  ;;  %v771_v58 = vmax.f32 %v717_v63, 0.0  ;;  %v768_v11 = vmax.f32 %v704_v16, 0.0  ;;  %v781_v2 = vpack.c.bf16 %v752_v7, %v751_v1 }
 0x22e   :  { %v794_v44 = vpack.c.bf16 %v778_v48, %v777_v49  ;;  %v776_v39 = vmax.f32 %v736_v0, 0.0  ;;  %v656_v48 = vadd.f32 %v3452_v9, %v655_v61  ;;  %v785_v49 = vpack.c.bf16 %v760_v41, %v759_v51 }
 0x22f   :  { %v757_v53 = vmax.f32 %v661_v54, 0.0  ;;  %v791_v43 = vpack.c.bf16 %v772_v50, %v771_v58  ;;  %v764_v51 = vmax.f32 %v688_v57, 0.0  ;;  %v748_v63 = vmax.f32 %v624_v23, 0.0 }
 0x230   :  { %2431 = vmatprep.subr.bf16.mxu1 %v794_v44  ;;  %v793_v15 = vpack.c.bf16 %v776_v39, %v775_v45  ;;  %v653_v44 = vadd.f32 %v3452_v9, %v652_v59  ;;  %v709_v45 = vadd.f32 %v2877_v6, %v3452_v9  ;;  %v756_v13 = vmax.f32 %v656_v48, 0.0 }
 0x231   :  { %2432 = vmatpush3.bf16.msra.mxu1 %v786_v25  ;;  %v784_v60 = vpack.c.bf16 %v758_v55, %v757_v53  ;;  %v696_v6 = vadd.f32 %v3474_v4, %v3452_v9  ;;  %v767_v39 = vmax.f32 %v701_v8, 0.0  ;;  %v765_v4 = vmax.f32 %v693_v12, 0.0 }
 0x232   :  { %2433 = vmatprep.subr.bf16.mxu1 %v793_v15  ;;  %v755_v61 = vmax.f32 %v653_v44, 0.0  ;;  %v769_v41 = vmax.f32 %v709_v45, 0.0  ;;  %v685_v15 = vadd.f32 %v3452_v9, %v3472_v3  ;;  %v3104_v3 = vld [vmem:[%s4106_s2 + $0x70] sm:$0xff]   ;;  %v747_v22 = vmax.f32 %v621_v42, 0.0  ;;  %v3105_v9 = vld [vmem:[%s4106_s2 + $0x68] sm:$0xff]  }
 0x233   :  { %v766_v46 = vmax.f32 %v696_v6, 0.0  ;;  %v789_v25 = vpack.c.bf16 %v768_v11, %v767_v39 }
 0x234   :  { %v783_v59 = vpack.c.bf16 %v756_v13, %v755_v61  ;;  %v790_v0 = vpack.c.bf16 %v770_v14, %v769_v41  ;;  %v763_v5 = vmax.f32 %v685_v15, 0.0  ;;  %v779_v48 = vpack.c.bf16 %v748_v63, %v747_v22 }
 0x235   :  { %2434 = vmatpush3.bf16.msra.mxu1 %v785_v49  ;;  %v788_v54 = vpack.c.bf16 %v766_v46, %v765_v4 }
 0x236   :  { %2435 = vmatprep.subr.bf16.mxu1 %v792_v52  ;;  %v787_v55 = vpack.c.bf16 %v764_v51, %v763_v5 }
 0x239   :  { %2436 = vmatpush3.bf16.msra.mxu1 %v784_v60 }
 0x23a   :  { %2437 = vmatprep.subr.bf16.mxu1 %v791_v43 }
 0x23d   :  { %2438 = vmatpush3.bf16.msra.mxu1 %v783_v59 }
 0x23e   :  { %2439 = vmatprep.subr.bf16.mxu1 %v790_v0 }
 0x241   :  { %2440 = vmatpush3.bf16.msra.mxu1 %v3466_v56  ;;  %v3103_v56 = vld [vmem:[%s4106_s2 + $0x78] sm:$0xff]  }
 0x242   :  { %2441 = vmatprep.subr.bf16.mxu1 %v789_v25  ;;  %2887 = vmatprep.subr.bf16.mxu0 %v3103_v56 }
 0x243   :  { %2888 = vmatpush3.bf16.msra.mxu0 %v3103_v56 }
 0x244   :  { %2889 = vmatprep.subr.bf16.mxu0 %v3104_v3 }
 0x245   :  { %2442 = vmatpush3.bf16.msra.mxu1 %v781_v2 }
 0x246   :  { %2443 = vmatprep.subr.bf16.mxu1 %v788_v54 }
 0x247   :  { %2890 = vmatpush3.bf16.msra.mxu0 %v3104_v3 }
 0x248   :  { %2891 = vmatprep.subr.bf16.mxu0 %v3105_v9 }
 0x249   :  { %2444 = vmatpush3.bf16.msra.mxu1 %v3458_v21 }
 0x24a   :  { %2445 = vmatprep.subr.bf16.mxu1 %v787_v55 }
 0x24b   :  { %2892 = vmatpush3.bf16.msra.mxu0 %v3105_v9 }
 0x24c   :  { %2893 = vmatprep.subr.bf16.mxu0 %v3106_v10 }
 0x24d   :  { %2446 = vmatpush3.bf16.msra.mxu1 %v779_v48 }
 0x24f   :  { %2894 = vmatpush3.bf16.msra.mxu0 %v3106_v10 }
 0x250   :  { %828 = vmatmul.mubr.bf16.vlgmr.msra.gmra.mxu1 %v3241_v17  ;;  %v3107_v17 = vld [vmem:[%s4106_s2 + $0x58] sm:$0xff]  }
 0x251   :  { %835 = vmatprep.mubr.bf16.mxu1 %v3246_v18  ;;  %2895 = vmatprep.subr.bf16.mxu0 %v3107_v17  ;;  %v3108_v18 = vld [vmem:[%s4106_s2 + $0x50] sm:$0xff]  }
 0x253   :  { %2896 = vmatpush3.bf16.msra.mxu0 %v3107_v17 }
 0x254   :  { %2897 = vmatprep.subr.bf16.mxu0 %v3108_v18 }
 0x257   :  { %2898 = vmatpush3.bf16.msra.mxu0 %v3108_v18 }
 0x258   :  { %836 = vmatmul.mubr.bf16.gmra.mxu1 %v3253_v19  ;;  %v4146_v19 = vld [vmem:[#allocation2_spill] sm:$0xff] }
 0x259   :  { %843 = vmatprep.mubr.bf16.mxu1 %v3258_v20  ;;  %v4147_v20 = vld [vmem:[#allocation3_spill] sm:$0xff] }
 0x260   :  { %844 = vmatmul.mubr.bf16.gmra.mxu1 %v3274_v24  ;;  %v3109_v24 = vld [vmem:[%s4106_s2 + $0x48] sm:$0xff]  }
 0x261   :  { %851 = vmatprep.mubr.bf16.mxu1 %v3282_v26  ;;  %2899 = vmatprep.subr.bf16.mxu0 %v3109_v24  ;;  %v3110_v26 = vld [vmem:[%s4106_s2 + $0x40] sm:$0xff]  }
 0x262   :  { %2900 = vmatpush3.bf16.msra.mxu0 %v3109_v24 }
 0x263   :  { %2901 = vmatprep.subr.bf16.mxu0 %v3110_v26 }
 0x266   :  { %2902 = vmatpush3.bf16.msra.mxu0 %v3110_v26 }
 0x268   :  { %852 = vmatmul.mubr.bf16.gmra.mxu1 %v3289_v27  ;;  %v4148_v27 = vld [vmem:[#allocation4_spill] sm:$0xff] }
 0x269   :  { %859 = vmatprep.mubr.bf16.mxu1 %v3294_v28  ;;  %v4149_v28 = vld [vmem:[#allocation5_spill] sm:$0xff] }
 0x270   :  { %860 = vmatmul.mubr.bf16.gmra.mxu1 %v3301_v29  ;;  %v4150_v29 = vld [vmem:[#allocation6_spill] sm:$0xff] }
 0x271   :  { %867 = vmatprep.mubr.bf16.mxu1 %v3306_v30  ;;  %v4151_v30 = vld [vmem:[#allocation7_spill] sm:$0xff] }
 0x278   :  { %868 = vmatmul.mubr.bf16.gmra.mxu1 %v3313_v31  ;;  %v4152_v31 = vld [vmem:[#allocation8_spill] sm:$0xff] }
 0x279   :  { %875 = vmatprep.mubr.bf16.mxu1 %v3318_v32  ;;  %v4153_v32 = vld [vmem:[#allocation9_spill] sm:$0xff] }
 0x280   :  { %876 = vmatmul.mubr.bf16.gmra.mxu1 %v3325_v33  ;;  %v4154_v33 = vld [vmem:[#allocation10_spill] sm:$0xff] }
 0x281   :  { %883 = vmatprep.mubr.bf16.mxu1 %v3330_v34  ;;  %v4155_v34 = vld [vmem:[#allocation11_spill] sm:$0xff] }
 0x288   :  { %884 = vmatmul.mubr.bf16.gmra.mxu1 %v3337_v35  ;;  %v4156_v35 = vld [vmem:[#allocation12_spill] sm:$0xff] }
 0x289   :  { %891 = vmatprep.mubr.bf16.mxu1 %v3342_v36  ;;  %v4157_v36 = vld [vmem:[#allocation13_spill] sm:$0xff] }
 0x290   :  { %892 = vmatmul.mubr.bf16.gmra.mxu1 %v3349_v37  ;;  %v4158_v37 = vld [vmem:[#allocation14_spill] sm:$0xff] }
 0x291   :  { %899 = vmatprep.mubr.bf16.mxu1 %v3354_v38 }
 0x298   :  { %900 = vmatmul.mubr.bf16.gmra.mxu1 %v4146_v19 }
 0x299   :  { %907 = vmatprep.mubr.bf16.mxu1 %v4147_v20 }
 0x2a0   :  { %908 = vmatmul.mubr.bf16.gmra.mxu1 %v4148_v27 }
 0x2a1   :  { %915 = vmatprep.mubr.bf16.mxu1 %v4149_v28 }
 0x2a8   :  { %916 = vmatmul.mubr.bf16.gmra.mxu1 %v4150_v29 }
 0x2a9   :  { %923 = vmatprep.mubr.bf16.mxu1 %v4151_v30 }
 0x2b0   :  { %924 = vmatmul.mubr.bf16.gmra.mxu1 %v4152_v31 }
 0x2b1   :  { %931 = vmatprep.mubr.bf16.mxu1 %v4153_v32 }
 0x2b8   :  { %932 = vmatmul.mubr.bf16.gmra.mxu1 %v4154_v33 }
 0x2b9   :  { %939 = vmatprep.mubr.bf16.mxu1 %v4155_v34 }
 0x2c0   :  { %940 = vmatmul.mubr.bf16.gmra.mxu1 %v4156_v35 }
 0x2c1   :  { %947 = vmatprep.mubr.bf16.mxu1 %v4157_v36 }
 0x2c8   :  { %948 = vmatmul.mubr.bf16.gmra.mxu1 %v4158_v37 }
 0x310   :  { %v2447_v38 = vpop.f32.mrf.mxu1 }
 0x312   :  { %v2448_v21 = vpop.f32.mrf.mxu1 }
 0x313   :  { %v2449_v52 = vadd.f32 %v2448_v21, %v2447_v38 }
 0x314   :  { %v2450_v49 = vpop.f32.mrf.mxu1 }
 0x316   :  { %v2451_v47 = vpop.f32.mrf.mxu1 }
 0x317   :  { %v2452_v50 = vadd.f32 %v2451_v47, %v2450_v49 }
 0x318   :  { %v2453_v53 = vpop.f32.mrf.mxu1 }
 0x319   :  { %v956_v44 = vpack.c.bf16 %v2452_v50, %v2449_v52 }
 0x31a   :  { %v2454_v45 = vpop.f32.mrf.mxu1 }
 0x31b   :  { %2903 = vmatprep.mubr.bf16.mxu0 %v956_v44  ;;  %v2455_v13 = vadd.f32 %v2454_v45, %v2453_v53 }
 0x31c   :  { %v2456_v58 = vpop.f32.mrf.mxu1 }
 0x31e   :  { %v2457_v60 = vpop.f32.mrf.mxu1 }
 0x31f   :  { %v2458_v14 = vadd.f32 %v2457_v60, %v2456_v58 }
 0x320   :  { %v2459_v16 = vpop.f32.mrf.mxu1 }
 0x321   :  { %v957_v43 = vpack.c.bf16 %v2458_v14, %v2455_v13 }
 0x322   :  { %v2460_v61 = vpop.f32.mrf.mxu1 }
 0x323   :  { %2904 = vmatmul.mubr.bf16.vlgmr.msra.gmra.mxu0 %v957_v43  ;;  %v2461_v40 = vadd.f32 %v2460_v61, %v2459_v16 }
 0x324   :  { %v2462_v41 = vpop.f32.mrf.mxu1 }
 0x326   :  { %v2463_v8 = vpop.f32.mrf.mxu1 }
 0x327   :  { %v2464_v59 = vadd.f32 %v2463_v8, %v2462_v41 }
 0x328   :  { %v2465_v6 = vpop.f32.mrf.mxu1 }
 0x329   :  { %v958_v0 = vpack.c.bf16 %v2464_v59, %v2461_v40 }
 0x32a   :  { %v2466_v11 = vpop.f32.mrf.mxu1 }
 0x32b   :  { %2907 = vmatprep.mubr.bf16.mxu0 %v958_v0  ;;  %v2467_v39 = vadd.f32 %v2466_v11, %v2465_v6 }
 0x32c   :  { %v2468_v62 = vpop.f32.mrf.mxu1 }
 0x32e   :  { %v2469_v12 = vpop.f32.mrf.mxu1 }
 0x32f   :  { %v2470_v7 = vadd.f32 %v2469_v12, %v2468_v62 }
 0x330   :  { %v2471_v46 = vpop.f32.mrf.mxu1 }
 0x331   :  { %v959_v57 = vpack.c.bf16 %v2470_v7, %v2467_v39 }
 0x332   :  { %v2472_v25 = vpop.f32.mrf.mxu1 }
 0x333   :  { %2908 = vmatmul.mubr.bf16.gmra.mxu0 %v959_v57  ;;  %v2473_v15 = vadd.f32 %v2472_v25, %v2471_v46 }
 0x334   :  { %v2474_v1 = vpop.f32.mrf.mxu1 }
 0x336   :  { %v2475_v4 = vpop.f32.mrf.mxu1 }
 0x337   :  { %v2476_v23 = vadd.f32 %v2475_v4, %v2474_v1 }
 0x338   :  { %v2477_v2 = vpop.f32.mrf.mxu1 }
 0x339   :  { %v960_v54 = vpack.c.bf16 %v2476_v23, %v2473_v15 }
 0x33a   :  { %v2478_v51 = vpop.f32.mrf.mxu1 }
 0x33b   :  { %2911 = vmatprep.mubr.bf16.mxu0 %v960_v54  ;;  %v2479_v63 = vadd.f32 %v2478_v51, %v2477_v2 }
 0x33c   :  { %v2480_v42 = vpop.f32.mrf.mxu1 }
 0x33e   :  { %v2481_v5 = vpop.f32.mrf.mxu1 }
 0x33f   :  { %v2482_v55 = vadd.f32 %v2481_v5, %v2480_v42 }
 0x340   :  { %v2483_v56 = vpop.f32.mrf.mxu1 }
 0x341   :  { %v961_v3 = vpack.c.bf16 %v2482_v55, %v2479_v63 }
 0x342   :  { %v2484_v22 = vpop.f32.mrf.mxu1 }
 0x343   :  { %2912 = vmatmul.mubr.bf16.gmra.mxu0 %v961_v3  ;;  %v2485_v10 = vadd.f32 %v2484_v22, %v2483_v56 }
 0x344   :  { %v2486_v48 = vpop.f32.mrf.mxu1 }
 0x346   :  { %v2487_v9 = vpop.f32.mrf.mxu1 }
 0x347   :  { %v2488_v17 = vadd.f32 %v2487_v9, %v2486_v48 }
 0x348   :  { %v2489_v18 = vpop.f32.mrf.mxu1 }
 0x349   :  { %v962_v19 = vpack.c.bf16 %v2488_v17, %v2485_v10 }
 0x34a   :  { %v2490_v20 = vpop.f32.mrf.mxu1 }
 0x34b   :  { %2915 = vmatprep.mubr.bf16.mxu0 %v962_v19  ;;  %v2491_v27 = vadd.f32 %v2490_v20, %v2489_v18  ;;  %v3574_v18 = vld [vmem:[%s4105_s0 + $0x4] ss:$8 sps:$4 sm:$0xff]   ;;  %v3580_v20 = vld [vmem:[%s4107_s3 + $0x1] ss:$0 sm:$0xff] }
 0x34c   :  { %v2492_v24 = vpop.f32.mrf.mxu1 }
 0x34e   :  { %v2493_v26 = vpop.f32.mrf.mxu1 }
 0x34f   :  { %v2494_v28 = vadd.f32 %v2493_v26, %v2492_v24 }
 0x350   :  { %v2495_v29 = vpop.f32.mrf.mxu1 }
 0x351   :  { %v963_v30 = vpack.c.bf16 %v2494_v28, %v2491_v27 }
 0x352   :  { %v2496_v31 = vpop.f32.mrf.mxu1 }
 0x353   :  { %2916 = vmatmul.mubr.bf16.gmra.mxu0 %v963_v30  ;;  %v2497_v34 = vadd.f32 %v2496_v31, %v2495_v29 }
 0x354   :  { %v2498_v32 = vpop.f32.mrf.mxu1 }
 0x356   :  { %v2499_v33 = vpop.f32.mrf.mxu1 }
 0x357   :  { %v2500_v35 = vadd.f32 %v2499_v33, %v2498_v32 }
 0x358   :  { %v2501_v36 = vpop.f32.mrf.mxu1 }
 0x359   :  { %v964_v37 = vpack.c.bf16 %v2500_v35, %v2497_v34 }
 0x35a   :  { %v2502_v38 = vpop.f32.mrf.mxu1 }
 0x35b   :  { %2919 = vmatprep.mubr.bf16.mxu0 %v964_v37  ;;  %v2503_v47 = vadd.f32 %v2502_v38, %v2501_v36 }
 0x35c   :  { %v2504_v21 = vpop.f32.mrf.mxu1 }
 0x35e   :  { %v2505_v49 = vpop.f32.mrf.mxu1 }
 0x35f   :  { %v2506_v52 = vadd.f32 %v2505_v49, %v2504_v21 }
 0x360   :  { %v2507_v50 = vpop.f32.mrf.mxu1 }
 0x361   :  { %v965_v53 = vpack.c.bf16 %v2506_v52, %v2503_v47 }
 0x362   :  { %v2508_v44 = vpop.f32.mrf.mxu1 }
 0x363   :  { %2920 = vmatmul.mubr.bf16.gmra.mxu0 %v965_v53  ;;  %v2509_v60 = vadd.f32 %v2508_v44, %v2507_v50 }
 0x364   :  { %v2510_v45 = vpop.f32.mrf.mxu1 }
 0x366   :  { %v2511_v58 = vpop.f32.mrf.mxu1 }
 0x367   :  { %v2512_v13 = vadd.f32 %v2511_v58, %v2510_v45 }
 0x368   :  { %v2513_v14 = vpop.f32.mrf.mxu1 }
 0x369   :  { %v966_v16 = vpack.c.bf16 %v2512_v13, %v2509_v60 }
 0x36a   :  { %v2514_v43 = vpop.f32.mrf.mxu1 }
 0x36b   :  { %2923 = vmatprep.mubr.bf16.mxu0 %v966_v16  ;;  %v2515_v8 = vadd.f32 %v2514_v43, %v2513_v14 }
 0x36c   :  { %v2516_v61 = vpop.f32.mrf.mxu1 }
 0x36e   :  { %v2517_v41 = vpop.f32.mrf.mxu1 }
 0x36f   :  { %v2518_v40 = vadd.f32 %v2517_v41, %v2516_v61 }
 0x370   :  { %v2519_v59 = vpop.f32.mrf.mxu1 }
 0x371   :  { %v967_v6 = vpack.c.bf16 %v2518_v40, %v2515_v8 }
 0x372   :  { %v2520_v0 = vpop.f32.mrf.mxu1 }
 0x373   :  { %2924 = vmatmul.mubr.bf16.gmra.mxu0 %v967_v6  ;;  %v2521_v12 = vadd.f32 %v2520_v0, %v2519_v59 }
 0x374   :  { %v2522_v11 = vpop.f32.mrf.mxu1 }
 0x376   :  { %v2523_v62 = vpop.f32.mrf.mxu1 }
 0x377   :  { %v2524_v39 = vadd.f32 %v2523_v62, %v2522_v11 }
 0x378   :  { %v2525_v7 = vpop.f32.mrf.mxu1 }
 0x379   :  { %v968_v46 = vpack.c.bf16 %v2524_v39, %v2521_v12 }
 0x37a   :  { %v2526_v57 = vpop.f32.mrf.mxu1 }
 0x37b   :  { %2927 = vmatprep.mubr.bf16.mxu0 %v968_v46  ;;  %v2527_v4 = vadd.f32 %v2526_v57, %v2525_v7 }
 0x37c   :  { %v2528_v25 = vpop.f32.mrf.mxu1 }
 0x37e   :  { %v2529_v1 = vpop.f32.mrf.mxu1 }
 0x37f   :  { %v2530_v15 = vadd.f32 %v2529_v1, %v2528_v25 }
 0x380   :  { %v2531_v23 = vpop.f32.mrf.mxu1 }
 0x381   :  { %v969_v2 = vpack.c.bf16 %v2530_v15, %v2527_v4 }
 0x382   :  { %v2532_v54 = vpop.f32.mrf.mxu1 }
 0x383   :  { %2928 = vmatmul.mubr.bf16.gmra.mxu0 %v969_v2  ;;  %v2533_v5 = vadd.f32 %v2532_v54, %v2531_v23 }
 0x384   :  { %v2534_v51 = vpop.f32.mrf.mxu1 }
 0x386   :  { %v2535_v42 = vpop.f32.mrf.mxu1 }
 0x387   :  { %v2536_v63 = vadd.f32 %v2535_v42, %v2534_v51 }
 0x388   :  { %v2537_v55 = vpop.f32.mrf.mxu1 }
 0x389   :  { %v970_v56 = vpack.c.bf16 %v2536_v63, %v2533_v5 }
 0x38a   :  { %v2538_v3 = vpop.f32.mrf.mxu1 }
 0x38b   :  { %2931 = vmatprep.mubr.bf16.mxu0 %v970_v56  ;;  %v2539_v9 = vadd.f32 %v2538_v3, %v2537_v55 }
 0x38c   :  { %v2540_v22 = vpop.f32.mrf.mxu1 }
 0x38e   :  { %v2541_v48 = vpop.f32.mrf.mxu1 }
 0x38f   :  { %v2542_v10 = vadd.f32 %v2541_v48, %v2540_v22 }
 0x391   :  { %v971_v17 = vpack.c.bf16 %v2542_v10, %v2539_v9 }
 0x393   :  { %2932 = vmatmul.mubr.bf16.gmra.mxu0 %v971_v17 }
 0x394   :  { %1286 = vmatprep.mubr.bf16.mxu0 %v3574_v18 }
 0x3e3   :  { %v2905_v19 = vpop.f32.mrf.mxu0 }
 0x3e4   :  { %v1088_v26 = vadd.f32 %v2905_v19, %v3580_v20 }
 0x3e5   :  { %v3582_v24 = vpop.f32.mrf.mxu0 }
 0x3e6   :  { %v1208_v29 = vmax.f32 %v1088_v26, 0.0 }
 0x3e7   :  { %v2906_v27 = vpop.f32.mrf.mxu0 }
 0x3e8   :  { %v1091_v28 = vadd.f32 %v2906_v27, %v3580_v20 }
 0x3e9   :  { %v3588_v32 = vpop.f32.mrf.mxu0 }
 0x3ea   :  { %v1209_v30 = vmax.f32 %v1091_v28, 0.0 }
 0x3ec   :  { %v3586_v31 = vpack.c.bf16 %v1209_v30, %v1208_v29 }
 0x3f3   :  { %v2909_v33 = vpop.f32.mrf.mxu0 }
 0x3f4   :  { %v1104_v35 = vadd.f32 %v2909_v33, %v3580_v20 }
 0x3f5   :  { %v3590_v34 = vpop.f32.mrf.mxu0 }
 0x3f6   :  { %v1212_v38 = vmax.f32 %v1104_v35, 0.0 }
 0x3f7   :  { %v2910_v36 = vpop.f32.mrf.mxu0 }
 0x3f8   :  { %v1107_v37 = vadd.f32 %v2910_v36, %v3580_v20 }
 0x3f9   :  { %v3596_v47 = vpop.f32.mrf.mxu0 }
 0x3fa   :  { %v1213_v21 = vmax.f32 %v1107_v37, 0.0 }
 0x3fc   :  { %v3594_v49 = vpack.c.bf16 %v1213_v21, %v1212_v38 }
 0x403   :  { %v2913_v52 = vpop.f32.mrf.mxu0 }
 0x404   :  { %v1120_v28 = vadd.f32 %v2913_v52, %v3580_v20 }
 0x405   :  { %v1111_v50 = vpop.f32.mrf.mxu0 }
 0x407   :  { %v2914_v53 = vpop.f32.mrf.mxu0 }
 0x408   :  { %v1123_v9 = vadd.f32 %v2914_v53, %v3580_v20 }
 0x409   :  { %v1114_v44 = vpop.f32.mrf.mxu0 }
 0x40a   :  { %v1217_v35 = vmax.f32 %v1123_v9, 0.0  ;;  %v1115_v36 = vadd.f32 %v3580_v20, %v1114_v44  ;;  %v3695_v9 = vld [vmem:[%s4105_s0 + $0x30] ss:$8 sps:$4 sm:$0xff]  }
 0x413   :  { %v2917_v45 = vpop.f32.mrf.mxu0 }
 0x414   :  { %v1136_v57 = vadd.f32 %v2917_v45, %v3580_v20  ;;  %v1216_v45 = vmax.f32 %v1120_v28, 0.0  ;;  %v3731_v28 = vld [vmem:[%s4105_s0 + $0x60] ss:$8 sps:$4 sm:$0xff]  }
 0x415   :  { %v1127_v58 = vpop.f32.mrf.mxu0 }
 0x416   :  { %v1220_v63 = vmax.f32 %v1136_v57, 0.0  ;;  %v1128_v55 = vadd.f32 %v3580_v20, %v1127_v58  ;;  %v1112_v58 = vadd.f32 %v3580_v20, %v1111_v50  ;;  %v1099_v50 = vadd.f32 %v3580_v20, %v3596_v47 }
 0x417   :  { %v2918_v60 = vpop.f32.mrf.mxu0  ;;  %v1096_v57 = vadd.f32 %v3580_v20, %v3590_v34  ;;  %v1083_v34 = vadd.f32 %v3580_v20, %v3588_v32 }
 0x418   :  { %v1139_v39 = vadd.f32 %v2918_v60, %v3580_v20  ;;  %v1218_v29 = vmax.f32 %v1128_v55, 0.0  ;;  %v1214_v44 = vmax.f32 %v1112_v58, 0.0  ;;  %v3665_v55 = vld [vmem:[%s4105_s0 + $0x14] ss:$8 sps:$4 sm:$0xff]   ;;  %v3118_v58 = vld [vmem:[%s4106_s2 + $0x80] sm:$0xff]  }
 0x419   :  { %v1130_v13 = vpop.f32.mrf.mxu0 }
 0x41a   :  { %v1221_v15 = vmax.f32 %v1139_v39, 0.0  ;;  %v1131_v23 = vadd.f32 %v3580_v20, %v1130_v13  ;;  %v1243_v13 = vpack.c.bf16 %v1217_v35, %v1216_v45  ;;  %v3755_v35 = vld [vmem:[%s4105_s0 + $0x80] ss:$8 sps:$4 sm:$0xff]  }
 0x41b   :  { %v3117_v45 = vld [vmem:[%s4106_s2 + $0x88] sm:$0xff]  }
 0x41c   :  { %v1245_v10 = vpack.c.bf16 %v1221_v15, %v1220_v63  ;;  %v1219_v17 = vmax.f32 %v1131_v23, 0.0  ;;  %v1210_v15 = vmax.f32 %v1096_v57, 0.0 }
 0x41e   :  { %v1244_v37 = vpack.c.bf16 %v1219_v17, %v1218_v29  ;;  %v3707_v17 = vld [vmem:[%s4105_s0 + $0x40] ss:$8 sps:$4 sm:$0xff]   ;;  %v3737_v29 = vld [vmem:[%s4105_s0 + $0x74] ss:$8 sps:$4 sm:$0xff]  }
 0x423   :  { %v3598_v14 = vpop.f32.mrf.mxu0 }
 0x425   :  { %v3600_v16 = vpop.f32.mrf.mxu0 }
 0x426   :  { %v1144_v23 = vadd.f32 %v3580_v20, %v3600_v16  ;;  %v3112_v16 = vld [vmem:[%s4106_s2 + $0xb0] sm:$0xff]  }
 0x427   :  { %v3602_v43 = vpop.f32.mrf.mxu0 }
 0x429   :  { %v3604_v61 = vpop.f32.mrf.mxu0 }
 0x42a   :  { %v1147_v47 = vadd.f32 %v3580_v20, %v3604_v61  ;;  %v1222_v61 = vmax.f32 %v1144_v23, 0.0 }
 0x433   :  { %v2925_v41 = vpop.f32.mrf.mxu0 }
 0x434   :  { %v1168_v52 = vadd.f32 %v2925_v41, %v3580_v20  ;;  %v1155_v41 = vadd.f32 %v3602_v43, %v3580_v20 }
 0x435   :  { %v1159_v8 = vpop.f32.mrf.mxu0 }
 0x437   :  { %v2926_v40 = vpop.f32.mrf.mxu0 }
 0x438   :  { %v1171_v38 = vadd.f32 %v2926_v40, %v3580_v20  ;;  %v1160_v40 = vadd.f32 %v3580_v20, %v1159_v8  ;;  %v1211_v8 = vmax.f32 %v1099_v50, 0.0  ;;  %v3851_v50 = vld [vmem:[%s4105_s0 + $0xf0] ss:$8 sps:$4 sm:$0xff]  }
 0x439   :  { %v1162_v59 = vpop.f32.mrf.mxu0  ;;  %4169 = vst [vmem:[#allocation12_spill] sm:$0xff] %v3851_v50 }
 0x443   :  { %v2929_v6 = vpop.f32.mrf.mxu0 }
 0x444   :  { %v1184_v56 = vadd.f32 %v2929_v6, %v3580_v20  ;;  %v1215_v6 = vmax.f32 %v1115_v36, 0.0  ;;  %v3761_v36 = vld [vmem:[%s4105_s0 + $0x94] ss:$8 sps:$4 sm:$0xff]  }
 0x445   :  { %v1175_v0 = vpop.f32.mrf.mxu0 }
 0x446   :  { %v1232_v30 = vmax.f32 %v1184_v56, 0.0  ;;  %v1176_v33 = vadd.f32 %v3580_v20, %v1175_v0  ;;  %v1229_v0 = vmax.f32 %v1171_v38, 0.0  ;;  %v1242_v39 = vpack.c.bf16 %v1215_v6, %v1214_v44  ;;  %v3671_v56 = vld [vmem:[%s4105_s0 + $0x10] ss:$8 sps:$4 sm:$0xff]   ;;  %v3809_v6 = vld [vmem:[%s4105_s0 + $0xc4] ss:$8 sps:$4 sm:$0xff]  }
 0x447   :  { %v2930_v11 = vpop.f32.mrf.mxu0  ;;  %v3116_v38 = vld [vmem:[%s4106_s2 + $0x90] sm:$0xff]   ;;  %4162 = vst [vmem:[#allocation5_spill] sm:$0xff] %v3809_v6  ;;  %v3833_v44 = vld [vmem:[%s4105_s0 + $0xe4] ss:$8 sps:$4 sm:$0xff]  }
 0x448   :  { %v1187_v54 = vadd.f32 %v2930_v11, %v3580_v20  ;;  %v1230_v60 = vmax.f32 %v1176_v33, 0.0  ;;  %v1163_v11 = vadd.f32 %v3580_v20, %v1162_v59  ;;  %v1152_v59 = vadd.f32 %v3598_v14, %v3580_v20  ;;  %v3749_v33 = vld [vmem:[%s4105_s0 + $0x84] ss:$8 sps:$4 sm:$0xff]   ;;  %4166 = vst [vmem:[#allocation9_spill] sm:$0xff] %v3833_v44 }
 0x449   :  { %v1178_v62 = vpop.f32.mrf.mxu0  ;;  %v1240_v14 = vpack.c.bf16 %v1211_v8, %v1210_v15 }
 0x44a   :  { %v1233_v19 = vmax.f32 %v1187_v54, 0.0  ;;  %v1179_v26 = vadd.f32 %v3580_v20, %v1178_v62  ;;  %v1224_v43 = vmax.f32 %v1152_v59, 0.0  ;;  %v1223_v54 = vmax.f32 %v1147_v47, 0.0 }
 0x44c   :  { %v1251_v21 = vpack.c.bf16 %v1233_v19, %v1232_v30  ;;  %v1231_v53 = vmax.f32 %v1179_v26, 0.0  ;;  %v3713_v19 = vld [vmem:[%s4105_s0 + $0x54] ss:$8 sps:$4 sm:$0xff]   ;;  %v3719_v26 = vld [vmem:[%s4105_s0 + $0x50] ss:$8 sps:$4 sm:$0xff]  }
 0x44d   :  { %v3743_v30 = vld [vmem:[%s4105_s0 + $0x70] ss:$8 sps:$4 sm:$0xff]  }
 0x44e   :  { %v1250_v62 = vpack.c.bf16 %v1231_v53, %v1230_v60  ;;  %v3779_v53 = vld [vmem:[%s4105_s0 + $0xa4] ss:$8 sps:$4 sm:$0xff]   ;;  %v3797_v60 = vld [vmem:[%s4105_s0 + $0xb4] ss:$8 sps:$4 sm:$0xff]  }
 0x44f   :  { %4160 = vst [vmem:[#allocation3_spill] sm:$0xff] %v3797_v60 }
 0x453   :  { %v2933_v12 = vpop.f32.mrf.mxu0 }
 0x454   :  { %v1200_v46 = vadd.f32 %v2933_v12, %v3580_v20  ;;  %v1228_v12 = vmax.f32 %v1168_v52, 0.0  ;;  %v3791_v52 = vld [vmem:[%s4105_s0 + $0xa0] ss:$8 sps:$4 sm:$0xff]  }
 0x455   :  { %v1191_v7 = vpop.f32.mrf.mxu0  ;;  %4159 = vst [vmem:[#allocation2_spill] sm:$0xff] %v3791_v52 }
 0x456   :  { %v1192_v1 = vadd.f32 %v3580_v20, %v1191_v7  ;;  %v1236_v51 = vmax.f32 %v1200_v46, 0.0  ;;  %v1249_v7 = vpack.c.bf16 %v1229_v0, %v1228_v12  ;;  %v1227_v46 = vmax.f32 %v1163_v11, 0.0  ;;  %v3815_v0 = vld [vmem:[%s4105_s0 + $0xc0] ss:$8 sps:$4 sm:$0xff]   ;;  %v3821_v11 = vld [vmem:[%s4105_s0 + $0xd4] ss:$8 sps:$4 sm:$0xff]  }
 0x457   :  { %v2934_v25 = vpop.f32.mrf.mxu0  ;;  %4163 = vst [vmem:[#allocation6_spill] sm:$0xff] %v3815_v0  ;;  %4164 = vst [vmem:[#allocation7_spill] sm:$0xff] %v3821_v11  ;;  %v3839_v12 = vld [vmem:[%s4105_s0 + $0xe0] ss:$8 sps:$4 sm:$0xff]  }
 0x458   :  { %v1203_v4 = vadd.f32 %v2934_v25, %v3580_v20  ;;  %v1234_v3 = vmax.f32 %v1192_v1, 0.0  ;;  %v1226_v25 = vmax.f32 %v1160_v40, 0.0  ;;  %v1225_v1 = vmax.f32 %v1155_v41, 0.0  ;;  %4167 = vst [vmem:[#allocation10_spill] sm:$0xff] %v3839_v12  ;;  %v3845_v40 = vld [vmem:[%s4105_s0 + $0xf4] ss:$8 sps:$4 sm:$0xff]  }
 0x459   :  { %v1194_v2 = vpop.f32.mrf.mxu0  ;;  %4168 = vst [vmem:[#allocation11_spill] sm:$0xff] %v3845_v40 }
 0x45a   :  { %v1237_v42 = vmax.f32 %v1203_v4, 0.0  ;;  %v1195_v5 = vadd.f32 %v3580_v20, %v1194_v2  ;;  %v1248_v4 = vpack.c.bf16 %v1227_v46, %v1226_v25  ;;  %v1247_v2 = vpack.c.bf16 %v1225_v1, %v1224_v43 }
 0x45c   :  { %v1253_v22 = vpack.c.bf16 %v1237_v42, %v1236_v51  ;;  %v1235_v48 = vmax.f32 %v1195_v5, 0.0  ;;  %v1080_v51 = vadd.f32 %v3580_v20, %v3582_v24  ;;  %v1207_v42 = vmax.f32 %v1083_v34, 0.0  ;;  %v3113_v20 = vld [vmem:[%s4106_s2 + $0xa8] sm:$0xff]  }
 0x45d   :  { %v1246_v5 = vpack.c.bf16 %v1223_v54, %v1222_v61  ;;  %v3656_v24 = vld [vmem:[%s4105_s0] ss:$8 sps:$4 sm:$0xff]  }
 0x45e   :  { %v1252_v27 = vpack.c.bf16 %v1235_v48, %v1234_v3  ;;  %2567 = vmatprep.subr.bf16.mxu0 %v1253_v22  ;;  %v1206_v32 = vmax.f32 %v1080_v51, 0.0  ;;  %v3677_v3 = vld [vmem:[%s4105_s0 + $0x24] ss:$8 sps:$4 sm:$0xff]   ;;  %v3683_v22 = vld [vmem:[%s4105_s0 + $0x20] ss:$8 sps:$4 sm:$0xff]  }
 0x45f   :  { %2568 = vmatpush3.bf16.msra.mxu0 %v1245_v10  ;;  %v3689_v48 = vld [vmem:[%s4105_s0 + $0x34] ss:$8 sps:$4 sm:$0xff]   ;;  %v3701_v10 = vld [vmem:[%s4105_s0 + $0x44] ss:$8 sps:$4 sm:$0xff]  }
 0x460   :  { %2569 = vmatprep.subr.bf16.mxu0 %v1252_v27  ;;  %v1238_v63 = vpack.c.bf16 %v1207_v42, %v1206_v32  ;;  %v3725_v27 = vld [vmem:[%s4105_s0 + $0x64] ss:$8 sps:$4 sm:$0xff]  }
 0x463   :  { %2570 = vmatpush3.bf16.msra.mxu0 %v1244_v37  ;;  %v3115_v37 = vld [vmem:[%s4106_s2 + $0x98] sm:$0xff]  }
 0x464   :  { %2571 = vmatprep.subr.bf16.mxu0 %v1251_v21  ;;  %v3773_v21 = vld [vmem:[%s4105_s0 + $0x90] ss:$8 sps:$4 sm:$0xff]  }
 0x467   :  { %2572 = vmatpush3.bf16.msra.mxu0 %v1243_v13  ;;  %v3803_v13 = vld [vmem:[%s4105_s0 + $0xb0] ss:$8 sps:$4 sm:$0xff]  }
 0x468   :  { %2573 = vmatprep.subr.bf16.mxu0 %v1250_v62  ;;  %4161 = vst [vmem:[#allocation4_spill] sm:$0xff] %v3803_v13  ;;  %v3827_v62 = vld [vmem:[%s4105_s0 + $0xd0] ss:$8 sps:$4 sm:$0xff]  }
 0x469   :  { %4165 = vst [vmem:[#allocation8_spill] sm:$0xff] %v3827_v62 }
 0x46b   :  { %2574 = vmatpush3.bf16.msra.mxu0 %v1242_v39 }
 0x46c   :  { %2575 = vmatprep.subr.bf16.mxu0 %v1249_v7 }
 0x46f   :  { %2576 = vmatpush3.bf16.msra.mxu0 %v3594_v49  ;;  %v3111_v49 = vld [vmem:[%s4106_s2 + $0xb8] sm:$0xff]  }
 0x470   :  { %2577 = vmatprep.subr.bf16.mxu0 %v1248_v4  ;;  %2935 = vmatprep.subr.bf16.mxu1 %v3111_v49 }
 0x471   :  { %2936 = vmatpush3.bf16.msra.mxu1 %v3111_v49 }
 0x472   :  { %2937 = vmatprep.subr.bf16.mxu1 %v3112_v16 }
 0x473   :  { %2578 = vmatpush3.bf16.msra.mxu0 %v1240_v14 }
 0x474   :  { %2579 = vmatprep.subr.bf16.mxu0 %v1247_v2 }
 0x475   :  { %2938 = vmatpush3.bf16.msra.mxu1 %v3112_v16 }
 0x476   :  { %2939 = vmatprep.subr.bf16.mxu1 %v3113_v20 }
 0x477   :  { %2580 = vmatpush3.bf16.msra.mxu0 %v3586_v31  ;;  %v3114_v31 = vld [vmem:[%s4106_s2 + $0xa0] sm:$0xff]  }
 0x478   :  { %2581 = vmatprep.subr.bf16.mxu0 %v1246_v5 }
 0x479   :  { %2940 = vmatpush3.bf16.msra.mxu1 %v3113_v20 }
 0x47a   :  { %2941 = vmatprep.subr.bf16.mxu1 %v3114_v31 }
 0x47b   :  { %2582 = vmatpush3.bf16.msra.mxu0 %v1238_v63 }
 0x47d   :  { %2942 = vmatpush3.bf16.msra.mxu1 %v3114_v31 }
 0x47e   :  { %1287 = vmatmul.mubr.bf16.vlgmr.msra.gmra.mxu0 %v3656_v24  ;;  %2943 = vmatprep.subr.bf16.mxu1 %v3115_v37 }
 0x47f   :  { %1294 = vmatprep.mubr.bf16.mxu0 %v3665_v55 }
 0x481   :  { %2944 = vmatpush3.bf16.msra.mxu1 %v3115_v37 }
 0x482   :  { %2945 = vmatprep.subr.bf16.mxu1 %v3116_v38 }
 0x485   :  { %2946 = vmatpush3.bf16.msra.mxu1 %v3116_v38 }
 0x486   :  { %1295 = vmatmul.mubr.bf16.gmra.mxu0 %v3671_v56  ;;  %2947 = vmatprep.subr.bf16.mxu1 %v3117_v45 }
 0x487   :  { %1302 = vmatprep.mubr.bf16.mxu0 %v3677_v3 }
 0x489   :  { %2948 = vmatpush3.bf16.msra.mxu1 %v3117_v45 }
 0x48a   :  { %2949 = vmatprep.subr.bf16.mxu1 %v3118_v58 }
 0x48d   :  { %2950 = vmatpush3.bf16.msra.mxu1 %v3118_v58 }
 0x48e   :  { %1303 = vmatmul.mubr.bf16.gmra.mxu0 %v3683_v22 }
 0x48f   :  { %1310 = vmatprep.mubr.bf16.mxu0 %v3689_v48 }
 0x496   :  { %1311 = vmatmul.mubr.bf16.gmra.mxu0 %v3695_v9 }
 0x497   :  { %1318 = vmatprep.mubr.bf16.mxu0 %v3701_v10 }
 0x49e   :  { %1319 = vmatmul.mubr.bf16.gmra.mxu0 %v3707_v17 }
 0x49f   :  { %1326 = vmatprep.mubr.bf16.mxu0 %v3713_v19 }
 0x4a6   :  { %1327 = vmatmul.mubr.bf16.gmra.mxu0 %v3719_v26 }
 0x4a7   :  { %1334 = vmatprep.mubr.bf16.mxu0 %v3725_v27 }
 0x4ae   :  { %1335 = vmatmul.mubr.bf16.gmra.mxu0 %v3731_v28 }
 0x4af   :  { %1342 = vmatprep.mubr.bf16.mxu0 %v3737_v29 }
 0x4b6   :  { %1343 = vmatmul.mubr.bf16.gmra.mxu0 %v3743_v30 }
 0x4b7   :  { %1350 = vmatprep.mubr.bf16.mxu0 %v3749_v33 }
 0x4be   :  { %1351 = vmatmul.mubr.bf16.gmra.mxu0 %v3755_v35 }
 0x4bf   :  { %1358 = vmatprep.mubr.bf16.mxu0 %v3761_v36 }
 0x4c6   :  { %1359 = vmatmul.mubr.bf16.gmra.mxu0 %v3773_v21 }
 0x4c7   :  { %1366 = vmatprep.mubr.bf16.mxu0 %v3779_v53 }
 0x4ce   :  { %1367 = vmatmul.mubr.bf16.gmra.mxu0 %v3791_v52 }
 0x4cf   :  { %1374 = vmatprep.mubr.bf16.mxu0 %v3797_v60 }
 0x4d6   :  { %1375 = vmatmul.mubr.bf16.gmra.mxu0 %v3803_v13 }
 0x4d7   :  { %1382 = vmatprep.mubr.bf16.mxu0 %v3809_v6 }
 0x4de   :  { %1383 = vmatmul.mubr.bf16.gmra.mxu0 %v3815_v0 }
 0x4df   :  { %1390 = vmatprep.mubr.bf16.mxu0 %v3821_v11 }
 0x4e6   :  { %1391 = vmatmul.mubr.bf16.gmra.mxu0 %v3827_v62 }
 0x4e7   :  { %1398 = vmatprep.mubr.bf16.mxu0 %v3833_v44 }
 0x4ee   :  { %1399 = vmatmul.mubr.bf16.gmra.mxu0 %v3839_v12 }
 0x4ef   :  { %1406 = vmatprep.mubr.bf16.mxu0 %v3845_v40 }
 0x4f6   :  { %1407 = vmatmul.mubr.bf16.gmra.mxu0 %v3851_v50 }
 0x53e   :  { %v2583_v39 = vpop.f32.mrf.mxu0 }
 0x540   :  { %v2584_v41 = vpop.f32.mrf.mxu0 }
 0x541   :  { %v2585_v57 = vadd.f32 %v2584_v41, %v2583_v39 }
 0x542   :  { %v2586_v7 = vpop.f32.mrf.mxu0 }
 0x544   :  { %v2587_v46 = vpop.f32.mrf.mxu0 }
 0x545   :  { %v2588_v59 = vadd.f32 %v2587_v46, %v2586_v7 }
 0x546   :  { %v2589_v25 = vpop.f32.mrf.mxu0 }
 0x547   :  { %v1415_v8 = vpack.c.bf16 %v2588_v59, %v2585_v57 }
 0x548   :  { %v2590_v1 = vpop.f32.mrf.mxu0 }
 0x549   :  { %2951 = vmatprep.mubr.bf16.mxu1 %v1415_v8  ;;  %v2591_v15 = vadd.f32 %v2590_v1, %v2589_v25 }
 0x54a   :  { %v2592_v47 = vpop.f32.mrf.mxu0 }
 0x54c   :  { %v2593_v4 = vpop.f32.mrf.mxu0 }
 0x54d   :  { %v2594_v43 = vadd.f32 %v2593_v4, %v2592_v47 }
 0x54e   :  { %v2595_v23 = vpop.f32.mrf.mxu0 }
 0x54f   :  { %v1416_v34 = vpack.c.bf16 %v2594_v43, %v2591_v15 }
 0x550   :  { %v2596_v14 = vpop.f32.mrf.mxu0 }
 0x551   :  { %2952 = vmatmul.mubr.bf16.vlgmr.msra.gmra.mxu1 %v1416_v34  ;;  %v2597_v51 = vadd.f32 %v2596_v14, %v2595_v23 }
 0x552   :  { %v2598_v2 = vpop.f32.mrf.mxu0 }
 0x554   :  { %v2599_v54 = vpop.f32.mrf.mxu0 }
 0x555   :  { %v2600_v61 = vadd.f32 %v2599_v54, %v2598_v2 }
 0x556   :  { %v2601_v42 = vpop.f32.mrf.mxu0 }
 0x557   :  { %v1417_v5 = vpack.c.bf16 %v2600_v61, %v2597_v51 }
 0x558   :  { %v2602_v49 = vpop.f32.mrf.mxu0 }
 0x559   :  { %2955 = vmatprep.mubr.bf16.mxu1 %v1417_v5  ;;  %v2603_v63 = vadd.f32 %v2602_v49, %v2601_v42 }
 0x55a   :  { %v2604_v16 = vpop.f32.mrf.mxu0 }
 0x55c   :  { %v2605_v32 = vpop.f32.mrf.mxu0 }
 0x55d   :  { %v2606_v20 = vadd.f32 %v2605_v32, %v2604_v16 }
 0x55e   :  { %v2607_v31 = vpop.f32.mrf.mxu0 }
 0x55f   :  { %v1418_v37 = vpack.c.bf16 %v2606_v20, %v2603_v63 }
 0x560   :  { %v2608_v38 = vpop.f32.mrf.mxu0 }
 0x561   :  { %2956 = vmatmul.mubr.bf16.gmra.mxu1 %v1418_v37  ;;  %v2609_v39 = vadd.f32 %v2608_v38, %v2607_v31 }
 0x562   :  { %v2610_v45 = vpop.f32.mrf.mxu0 }
 0x564   :  { %v2611_v58 = vpop.f32.mrf.mxu0 }
 0x565   :  { %v2612_v41 = vadd.f32 %v2611_v58, %v2610_v45 }
 0x566   :  { %v2613_v7 = vpop.f32.mrf.mxu0 }
 0x567   :  { %v1419_v46 = vpack.c.bf16 %v2612_v41, %v2609_v39 }
 0x568   :  { %v2614_v57 = vpop.f32.mrf.mxu0 }
 0x569   :  { %2959 = vmatprep.mubr.bf16.mxu1 %v1419_v46  ;;  %v2615_v8 = vadd.f32 %v2614_v57, %v2613_v7 }
 0x56a   :  { %v2616_v59 = vpop.f32.mrf.mxu0 }
 0x56c   :  { %v2617_v25 = vpop.f32.mrf.mxu0 }
 0x56d   :  { %v2618_v1 = vadd.f32 %v2617_v25, %v2616_v59 }
 0x56e   :  { %v2619_v47 = vpop.f32.mrf.mxu0 }
 0x56f   :  { %v1420_v4 = vpack.c.bf16 %v2618_v1, %v2615_v8 }
 0x570   :  { %v2620_v15 = vpop.f32.mrf.mxu0 }
 0x571   :  { %2960 = vmatmul.mubr.bf16.gmra.mxu1 %v1420_v4  ;;  %v2621_v34 = vadd.f32 %v2620_v15, %v2619_v47 }
 0x572   :  { %v2622_v43 = vpop.f32.mrf.mxu0 }
 0x574   :  { %v2623_v23 = vpop.f32.mrf.mxu0 }
 0x575   :  { %v2624_v14 = vadd.f32 %v2623_v23, %v2622_v43 }
 0x576   :  { %v2625_v2 = vpop.f32.mrf.mxu0 }
 0x577   :  { %v1421_v54 = vpack.c.bf16 %v2624_v14, %v2621_v34 }
 0x578   :  { %v2626_v51 = vpop.f32.mrf.mxu0 }
 0x579   :  { %2963 = vmatprep.mubr.bf16.mxu1 %v1421_v54  ;;  %v2627_v5 = vadd.f32 %v2626_v51, %v2625_v2 }
 0x57a   :  { %v2628_v61 = vpop.f32.mrf.mxu0 }
 0x57c   :  { %v2629_v42 = vpop.f32.mrf.mxu0 }
 0x57d   :  { %v2630_v49 = vadd.f32 %v2629_v42, %v2628_v61 }
 0x57e   :  { %v2631_v16 = vpop.f32.mrf.mxu0 }
 0x57f   :  { %v1422_v32 = vpack.c.bf16 %v2630_v49, %v2627_v5 }
 0x580   :  { %v2632_v63 = vpop.f32.mrf.mxu0 }
 0x581   :  { %2964 = vmatmul.mubr.bf16.gmra.mxu1 %v1422_v32  ;;  %v2633_v37 = vadd.f32 %v2632_v63, %v2631_v16 }
 0x582   :  { %v2634_v20 = vpop.f32.mrf.mxu0 }
 0x584   :  { %v2635_v31 = vpop.f32.mrf.mxu0 }
 0x585   :  { %v2636_v38 = vadd.f32 %v2635_v31, %v2634_v20 }
 0x586   :  { %v2637_v45 = vpop.f32.mrf.mxu0 }
 0x587   :  { %v1423_v58 = vpack.c.bf16 %v2636_v38, %v2633_v37 }
 0x588   :  { %v2638_v39 = vpop.f32.mrf.mxu0 }
 0x589   :  { %2967 = vmatprep.mubr.bf16.mxu1 %v1423_v58  ;;  %v2639_v46 = vadd.f32 %v2638_v39, %v2637_v45 }
 0x58a   :  { %v2640_v41 = vpop.f32.mrf.mxu0 }
 0x58c   :  { %v2641_v7 = vpop.f32.mrf.mxu0 }
 0x58d   :  { %v2642_v57 = vadd.f32 %v2641_v7, %v2640_v41 }
 0x58e   :  { %v2643_v59 = vpop.f32.mrf.mxu0 }
 0x58f   :  { %v1424_v25 = vpack.c.bf16 %v2642_v57, %v2639_v46 }
 0x590   :  { %v2644_v8 = vpop.f32.mrf.mxu0 }
 0x591   :  { %2968 = vmatmul.mubr.bf16.gmra.mxu1 %v1424_v25  ;;  %v2645_v4 = vadd.f32 %v2644_v8, %v2643_v59 }
 0x592   :  { %v2646_v1 = vpop.f32.mrf.mxu0 }
 0x594   :  { %v2647_v47 = vpop.f32.mrf.mxu0 }
 0x595   :  { %v2648_v15 = vadd.f32 %v2647_v47, %v2646_v1 }
 0x596   :  { %v2649_v43 = vpop.f32.mrf.mxu0 }
 0x597   :  { %v1425_v23 = vpack.c.bf16 %v2648_v15, %v2645_v4 }
 0x598   :  { %v2650_v34 = vpop.f32.mrf.mxu0 }
 0x599   :  { %2971 = vmatprep.mubr.bf16.mxu1 %v1425_v23  ;;  %v2651_v54 = vadd.f32 %v2650_v34, %v2649_v43 }
 0x59a   :  { %v2652_v14 = vpop.f32.mrf.mxu0 }
 0x59c   :  { %v2653_v2 = vpop.f32.mrf.mxu0 }
 0x59d   :  { %v2654_v51 = vadd.f32 %v2653_v2, %v2652_v14 }
 0x59e   :  { %v2655_v61 = vpop.f32.mrf.mxu0 }
 0x59f   :  { %v1426_v42 = vpack.c.bf16 %v2654_v51, %v2651_v54  ;;  %v3858_v54 = vld [vmem:[%s4107_s3 + $0x2] ss:$0 sm:$0xff] }
 0x5a0   :  { %v2656_v5 = vpop.f32.mrf.mxu0 }
 0x5a1   :  { %2972 = vmatmul.mubr.bf16.gmra.mxu1 %v1426_v42  ;;  %v2657_v32 = vadd.f32 %v2656_v5, %v2655_v61 }
 0x5a2   :  { %v2658_v49 = vpop.f32.mrf.mxu0 }
 0x5a4   :  { %v2659_v16 = vpop.f32.mrf.mxu0 }
 0x5a5   :  { %v2660_v63 = vadd.f32 %v2659_v16, %v2658_v49 }
 0x5a6   :  { %v2661_v20 = vpop.f32.mrf.mxu0 }
 0x5a7   :  { %v1427_v31 = vpack.c.bf16 %v2660_v63, %v2657_v32 }
 0x5a8   :  { %v2662_v37 = vpop.f32.mrf.mxu0 }
 0x5a9   :  { %2975 = vmatprep.mubr.bf16.mxu1 %v1427_v31  ;;  %v2663_v58 = vadd.f32 %v2662_v37, %v2661_v20 }
 0x5aa   :  { %v2664_v38 = vpop.f32.mrf.mxu0 }
 0x5ac   :  { %v2665_v45 = vpop.f32.mrf.mxu0 }
 0x5ad   :  { %v2666_v39 = vadd.f32 %v2665_v45, %v2664_v38 }
 0x5ae   :  { %v2667_v41 = vpop.f32.mrf.mxu0 }
 0x5af   :  { %v1428_v7 = vpack.c.bf16 %v2666_v39, %v2663_v58 }
 0x5b0   :  { %v2668_v46 = vpop.f32.mrf.mxu0 }
 0x5b1   :  { %2976 = vmatmul.mubr.bf16.gmra.mxu1 %v1428_v7  ;;  %v2669_v25 = vadd.f32 %v2668_v46, %v2667_v41 }
 0x5b2   :  { %v2670_v57 = vpop.f32.mrf.mxu0 }
 0x5b4   :  { %v2671_v59 = vpop.f32.mrf.mxu0 }
 0x5b5   :  { %v2672_v8 = vadd.f32 %v2671_v59, %v2670_v57 }
 0x5b6   :  { %v2673_v1 = vpop.f32.mrf.mxu0 }
 0x5b7   :  { %v1429_v47 = vpack.c.bf16 %v2672_v8, %v2669_v25 }
 0x5b8   :  { %v2674_v4 = vpop.f32.mrf.mxu0 }
 0x5b9   :  { %2979 = vmatprep.mubr.bf16.mxu1 %v1429_v47  ;;  %v2675_v23 = vadd.f32 %v2674_v4, %v2673_v1 }
 0x5ba   :  { %v2676_v15 = vpop.f32.mrf.mxu0 }
 0x5bc   :  { %v2677_v43 = vpop.f32.mrf.mxu0 }
 0x5bd   :  { %v2678_v34 = vadd.f32 %v2677_v43, %v2676_v15 }
 0x5bf   :  { %v1430_v14 = vpack.c.bf16 %v2678_v34, %v2675_v23 }
 0x5c1   :  { %2980 = vmatmul.mubr.bf16.gmra.mxu1 %v1430_v14 }
 0x5c2   :  { %1745 = vmatprep.mubr.bf16.mxu1 %v3574_v18 }
 0x611   :  { %v2953_v2 = vpop.f32.mrf.mxu1 }
 0x612   :  { %v1547_v61 = vadd.f32 %v2953_v2, %v3858_v54 }
 0x613   :  { %v1538_v51 = vpop.f32.mrf.mxu1 }
 0x614   :  { %v1539_v5 = vadd.f32 %v3858_v54, %v1538_v51  ;;  %v1667_v32 = vmax.f32 %v1547_v61, 0.0 }
 0x615   :  { %v2954_v42 = vpop.f32.mrf.mxu1 }
 0x616   :  { %v1550_v49 = vadd.f32 %v2954_v42, %v3858_v54  ;;  %v1665_v18 = vmax.f32 %v1539_v5, 0.0 }
 0x617   :  { %v1541_v16 = vpop.f32.mrf.mxu1 }
 0x618   :  { %v1668_v63 = vmax.f32 %v1550_v49, 0.0  ;;  %v1542_v20 = vadd.f32 %v3858_v54, %v1541_v16 }
 0x61a   :  { %v3864_v31 = vpack.c.bf16 %v1668_v63, %v1667_v32  ;;  %v1666_v37 = vmax.f32 %v1542_v20, 0.0 }
 0x61c   :  { %v3866_v38 = vpack.c.bf16 %v1666_v37, %v1665_v18 }
 0x621   :  { %v2957_v45 = vpop.f32.mrf.mxu1 }
 0x622   :  { %v1563_v39 = vadd.f32 %v2957_v45, %v3858_v54 }
 0x623   :  { %v1554_v58 = vpop.f32.mrf.mxu1 }
 0x624   :  { %v1555_v7 = vadd.f32 %v3858_v54, %v1554_v58  ;;  %v1671_v59 = vmax.f32 %v1563_v39, 0.0 }
 0x625   :  { %v2958_v41 = vpop.f32.mrf.mxu1 }
 0x626   :  { %v1566_v46 = vadd.f32 %v2958_v41, %v3858_v54  ;;  %v1669_v1 = vmax.f32 %v1555_v7, 0.0 }
 0x627   :  { %v1557_v57 = vpop.f32.mrf.mxu1 }
 0x628   :  { %v1672_v25 = vmax.f32 %v1566_v46, 0.0  ;;  %v1558_v8 = vadd.f32 %v3858_v54, %v1557_v57 }
 0x62a   :  { %v3872_v47 = vpack.c.bf16 %v1672_v25, %v1671_v59  ;;  %v1670_v4 = vmax.f32 %v1558_v8, 0.0 }
 0x62c   :  { %v3874_v15 = vpack.c.bf16 %v1670_v4, %v1669_v1 }
 0x631   :  { %v2961_v43 = vpop.f32.mrf.mxu1 }
 0x633   :  { %v1570_v23 = vpop.f32.mrf.mxu1 }
 0x635   :  { %v2962_v34 = vpop.f32.mrf.mxu1 }
 0x637   :  { %v1573_v14 = vpop.f32.mrf.mxu1 }
 0x641   :  { %v2965_v2 = vpop.f32.mrf.mxu1 }
 0x642   :  { %v1595_v25 = vadd.f32 %v2965_v2, %v3858_v54 }
 0x643   :  { %v1586_v51 = vpop.f32.mrf.mxu1 }
 0x644   :  { %v1679_v0 = vmax.f32 %v1595_v25, 0.0 }
 0x645   :  { %v2966_v61 = vpop.f32.mrf.mxu1 }
 0x646   :  { %v1598_v46 = vadd.f32 %v2966_v61, %v3858_v54 }
 0x647   :  { %v1589_v42 = vpop.f32.mrf.mxu1 }
 0x648   :  { %v1680_v50 = vmax.f32 %v1598_v46, 0.0  ;;  %v1590_v40 = vadd.f32 %v3858_v54, %v1589_v42 }
 0x64a   :  { %v1704_v46 = vpack.c.bf16 %v1680_v50, %v1679_v0  ;;  %v1678_v60 = vmax.f32 %v1590_v40, 0.0 }
 0x651   :  { %v3876_v5 = vpop.f32.mrf.mxu1 }
 0x653   :  { %v3878_v49 = vpop.f32.mrf.mxu1 }
 0x655   :  { %v3880_v16 = vpop.f32.mrf.mxu1 }
 0x657   :  { %v3882_v32 = vpop.f32.mrf.mxu1 }
 0x661   :  { %v2973_v63 = vpop.f32.mrf.mxu1 }
 0x663   :  { %v1618_v20 = vpop.f32.mrf.mxu1 }
 0x665   :  { %v2974_v18 = vpop.f32.mrf.mxu1 }
 0x666   :  { %v1630_v0 = vadd.f32 %v2974_v18, %v3858_v54  ;;  %v1619_v18 = vadd.f32 %v3858_v54, %v1618_v20 }
 0x667   :  { %v1621_v37 = vpop.f32.mrf.mxu1 }
 0x671   :  { %v2977_v45 = vpop.f32.mrf.mxu1 }
 0x672   :  { %v1643_v2 = vadd.f32 %v2977_v45, %v3858_v54 }
 0x673   :  { %v1634_v58 = vpop.f32.mrf.mxu1 }
 0x674   :  { %v1691_v25 = vmax.f32 %v1643_v2, 0.0  ;;  %v1685_v2 = vmax.f32 %v1619_v18, 0.0 }
 0x675   :  { %v2978_v39 = vpop.f32.mrf.mxu1 }
 0x676   :  { %v1646_v44 = vadd.f32 %v2978_v39, %v3858_v54 }
 0x677   :  { %v1637_v41 = vpop.f32.mrf.mxu1 }
 0x678   :  { %v1692_v42 = vmax.f32 %v1646_v44, 0.0  ;;  %v1638_v52 = vadd.f32 %v3858_v54, %v1637_v41 }
 0x67a   :  { %v1710_v40 = vpack.c.bf16 %v1692_v42, %v1691_v25  ;;  %v1690_v44 = vmax.f32 %v1638_v52, 0.0 }
 0x681   :  { %v2981_v7 = vpop.f32.mrf.mxu1 }
 0x682   :  { %v1659_v59 = vadd.f32 %v2981_v7, %v3858_v54  ;;  %v1587_v7 = vadd.f32 %v3858_v54, %v1586_v51  ;;  %v1635_v51 = vadd.f32 %v3858_v54, %v1634_v58  ;;  %v1688_v58 = vmax.f32 %v1630_v0, 0.0 }
 0x683   :  { %v1650_v57 = vpop.f32.mrf.mxu1 }
 0x684   :  { %v1651_v1 = vadd.f32 %v3858_v54, %v1650_v57  ;;  %v1695_v62 = vmax.f32 %v1659_v59, 0.0  ;;  %v1579_v59 = vadd.f32 %v2961_v43, %v3858_v54  ;;  %v1689_v43 = vmax.f32 %v1635_v51, 0.0 }
 0x685   :  { %v2982_v8 = vpop.f32.mrf.mxu1 }
 0x686   :  { %v1662_v4 = vadd.f32 %v2982_v8, %v3858_v54  ;;  %v1693_v6 = vmax.f32 %v1651_v1, 0.0  ;;  %v1582_v8 = vadd.f32 %v2962_v34, %v3858_v54  ;;  %v1675_v50 = vmax.f32 %v1579_v59, 0.0  ;;  %v3119_v59 = vld [vmem:[%s4106_s2 + $0xf8] sm:$0xff]  }
 0x687   :  { %v1653_v12 = vpop.f32.mrf.mxu1  ;;  %v1622_v1 = vadd.f32 %v3858_v54, %v1621_v37  ;;  %2983 = vmatprep.subr.bf16.mxu0 %v3119_v59 }
 0x688   :  { %v1696_v11 = vmax.f32 %v1662_v4, 0.0  ;;  %v1654_v61 = vadd.f32 %v3858_v54, %v1653_v12  ;;  %v1677_v12 = vmax.f32 %v1587_v7, 0.0  ;;  %v1676_v45 = vmax.f32 %v1582_v8, 0.0  ;;  %2984 = vmatpush3.bf16.msra.mxu0 %v3119_v59 }
 0x689   :  { %v1709_v4 = vpack.c.bf16 %v1690_v44, %v1689_v43  ;;  %v1611_v7 = vadd.f32 %v3876_v5, %v3858_v54 }
 0x68a   :  { %v1712_v13 = vpack.c.bf16 %v1696_v11, %v1695_v62  ;;  %v1694_v57 = vmax.f32 %v1654_v61, 0.0  ;;  %v1574_v11 = vadd.f32 %v3858_v54, %v1573_v14  ;;  %v1703_v62 = vpack.c.bf16 %v1678_v60, %v1677_v12 }
 0x68b   :  { %v1702_v34 = vpack.c.bf16 %v1676_v45, %v1675_v50  ;;  %v1683_v20 = vmax.f32 %v1611_v7, 0.0 }
 0x68c   :  { %v1711_v39 = vpack.c.bf16 %v1694_v57, %v1693_v6  ;;  %2703 = vmatprep.subr.bf16.mxu1 %v1712_v13  ;;  %v1571_v6 = vadd.f32 %v3858_v54, %v1570_v23  ;;  %v1627_v13 = vadd.f32 %v2973_v63, %v3858_v54  ;;  %v1674_v41 = vmax.f32 %v1574_v11, 0.0 }
 0x68d   :  { %2704 = vmatpush3.bf16.msra.mxu1 %v1704_v46  ;;  %v1614_v23 = vadd.f32 %v3880_v16, %v3858_v54  ;;  %v1686_v63 = vmax.f32 %v1622_v1, 0.0  ;;  %v1606_v57 = vadd.f32 %v3858_v54, %v3882_v32  ;;  %v1603_v46 = vadd.f32 %v3858_v54, %v3878_v49  ;;  %v3121_v54 = vld [vmem:[%s4106_s2 + $0xe8] sm:$0xff]  }
 0x68e   :  { %2705 = vmatprep.subr.bf16.mxu1 %v1711_v39  ;;  %v1673_v14 = vmax.f32 %v1571_v6, 0.0  ;;  %v1687_v60 = vmax.f32 %v1627_v13, 0.0 }
 0x68f   :  { %v1684_v37 = vmax.f32 %v1614_v23, 0.0  ;;  %v1707_v8 = vpack.c.bf16 %v1686_v63, %v1685_v2  ;;  %v1682_v42 = vmax.f32 %v1606_v57, 0.0  ;;  %v1681_v39 = vmax.f32 %v1603_v46, 0.0 }
 0x690   :  { %v1701_v52 = vpack.c.bf16 %v1674_v41, %v1673_v14  ;;  %v1708_v61 = vpack.c.bf16 %v1688_v58, %v1687_v60 }
 0x691   :  { %2706 = vmatpush3.bf16.msra.mxu1 %v1703_v62  ;;  %v1706_v16 = vpack.c.bf16 %v1684_v37, %v1683_v20  ;;  %v1705_v5 = vpack.c.bf16 %v1682_v42, %v1681_v39 }
 0x692   :  { %2707 = vmatprep.subr.bf16.mxu1 %v1710_v40 }
 0x695   :  { %2708 = vmatpush3.bf16.msra.mxu1 %v1702_v34 }
 0x696   :  { %2709 = vmatprep.subr.bf16.mxu1 %v1709_v4 }
 0x699   :  { %2710 = vmatpush3.bf16.msra.mxu1 %v1701_v52 }
 0x69a   :  { %2711 = vmatprep.subr.bf16.mxu1 %v1708_v61 }
 0x69d   :  { %2712 = vmatpush3.bf16.msra.mxu1 %v3872_v47  ;;  %v3120_v47 = vld [vmem:[%s4106_s2 + $0xf0] sm:$0xff]  }
 0x69e   :  { %2713 = vmatprep.subr.bf16.mxu1 %v1707_v8  ;;  %2985 = vmatprep.subr.bf16.mxu0 %v3120_v47 }
 0x69f   :  { %2986 = vmatpush3.bf16.msra.mxu0 %v3120_v47 }
 0x6a0   :  { %2987 = vmatprep.subr.bf16.mxu0 %v3121_v54 }
 0x6a1   :  { %2714 = vmatpush3.bf16.msra.mxu1 %v3874_v15  ;;  %v3122_v15 = vld [vmem:[%s4106_s2 + $0xe0] sm:$0xff]  }
 0x6a2   :  { %2715 = vmatprep.subr.bf16.mxu1 %v1706_v16 }
 0x6a3   :  { %2988 = vmatpush3.bf16.msra.mxu0 %v3121_v54 }
 0x6a4   :  { %2989 = vmatprep.subr.bf16.mxu0 %v3122_v15 }
 0x6a5   :  { %2716 = vmatpush3.bf16.msra.mxu1 %v3864_v31 }
 0x6a6   :  { %2717 = vmatprep.subr.bf16.mxu1 %v1705_v5 }
 0x6a7   :  { %2990 = vmatpush3.bf16.msra.mxu0 %v3122_v15 }
 0x6a9   :  { %2718 = vmatpush3.bf16.msra.mxu1 %v3866_v38 }
 0x6ac   :  { %1746 = vmatmul.mubr.bf16.vlgmr.msra.gmra.mxu1 %v3656_v24  ;;  %v3123_v24 = vld [vmem:[%s4106_s2 + $0xd8] sm:$0xff]  }
 0x6ad   :  { %1753 = vmatprep.mubr.bf16.mxu1 %v3665_v55  ;;  %2991 = vmatprep.subr.bf16.mxu0 %v3123_v24  ;;  %v3124_v55 = vld [vmem:[%s4106_s2 + $0xd0] sm:$0xff]  }
 0x6ae   :  { %2992 = vmatpush3.bf16.msra.mxu0 %v3123_v24 }
 0x6af   :  { %2993 = vmatprep.subr.bf16.mxu0 %v3124_v55 }
 0x6b2   :  { %2994 = vmatpush3.bf16.msra.mxu0 %v3124_v55 }
 0x6b4   :  { %1754 = vmatmul.mubr.bf16.gmra.mxu1 %v3671_v56  ;;  %v3125_v56 = vld [vmem:[%s4106_s2 + $0xc8] sm:$0xff]  }
 0x6b5   :  { %1761 = vmatprep.mubr.bf16.mxu1 %v3677_v3  ;;  %2995 = vmatprep.subr.bf16.mxu0 %v3125_v56  ;;  %v3126_v3 = vld [vmem:[%s4106_s2 + $0xc0] sm:$0xff]  }
 0x6b6   :  { %2996 = vmatpush3.bf16.msra.mxu0 %v3125_v56 }
 0x6b7   :  { %2997 = vmatprep.subr.bf16.mxu0 %v3126_v3 }
 0x6ba   :  { %2998 = vmatpush3.bf16.msra.mxu0 %v3126_v3 }
 0x6bc   :  { %1762 = vmatmul.mubr.bf16.gmra.mxu1 %v3683_v22  ;;  %v4170_v22 = vld [vmem:[#allocation2_spill] sm:$0xff] }
 0x6bd   :  { %1769 = vmatprep.mubr.bf16.mxu1 %v3689_v48  ;;  %v4171_v48 = vld [vmem:[#allocation3_spill] sm:$0xff] }
 0x6c4   :  { %1770 = vmatmul.mubr.bf16.gmra.mxu1 %v3695_v9  ;;  %v4172_v9 = vld [vmem:[#allocation4_spill] sm:$0xff] }
 0x6c5   :  { %1777 = vmatprep.mubr.bf16.mxu1 %v3701_v10  ;;  %v4173_v10 = vld [vmem:[#allocation5_spill] sm:$0xff] }
 0x6cc   :  { %1778 = vmatmul.mubr.bf16.gmra.mxu1 %v3707_v17  ;;  %v4174_v17 = vld [vmem:[#allocation6_spill] sm:$0xff] }
 0x6cd   :  { %1785 = vmatprep.mubr.bf16.mxu1 %v3713_v19  ;;  %v4175_v19 = vld [vmem:[#allocation7_spill] sm:$0xff] }
 0x6d4   :  { %1786 = vmatmul.mubr.bf16.gmra.mxu1 %v3719_v26  ;;  %v4176_v26 = vld [vmem:[#allocation8_spill] sm:$0xff] }
 0x6d5   :  { %1793 = vmatprep.mubr.bf16.mxu1 %v3725_v27  ;;  %v4177_v27 = vld [vmem:[#allocation9_spill] sm:$0xff] }
 0x6dc   :  { %1794 = vmatmul.mubr.bf16.gmra.mxu1 %v3731_v28  ;;  %v4178_v28 = vld [vmem:[#allocation10_spill] sm:$0xff] }
 0x6dd   :  { %1801 = vmatprep.mubr.bf16.mxu1 %v3737_v29  ;;  %v4179_v29 = vld [vmem:[#allocation11_spill] sm:$0xff] }
 0x6e4   :  { %1802 = vmatmul.mubr.bf16.gmra.mxu1 %v3743_v30  ;;  %v4180_v30 = vld [vmem:[#allocation12_spill] sm:$0xff] }
 0x6e5   :  { %1809 = vmatprep.mubr.bf16.mxu1 %v3749_v33 }
 0x6ec   :  { %1810 = vmatmul.mubr.bf16.gmra.mxu1 %v3755_v35 }
 0x6ed   :  { %1817 = vmatprep.mubr.bf16.mxu1 %v3761_v36 }
 0x6f4   :  { %1818 = vmatmul.mubr.bf16.gmra.mxu1 %v3773_v21 }
 0x6f5   :  { %1825 = vmatprep.mubr.bf16.mxu1 %v3779_v53 }
 0x6fc   :  { %1826 = vmatmul.mubr.bf16.gmra.mxu1 %v4170_v22 }
 0x6fd   :  { %1833 = vmatprep.mubr.bf16.mxu1 %v4171_v48 }
 0x704   :  { %1834 = vmatmul.mubr.bf16.gmra.mxu1 %v4172_v9 }
 0x705   :  { %1841 = vmatprep.mubr.bf16.mxu1 %v4173_v10 }
 0x70c   :  { %1842 = vmatmul.mubr.bf16.gmra.mxu1 %v4174_v17 }
 0x70d   :  { %1849 = vmatprep.mubr.bf16.mxu1 %v4175_v19 }
 0x714   :  { %1850 = vmatmul.mubr.bf16.gmra.mxu1 %v4176_v26 }
 0x715   :  { %1857 = vmatprep.mubr.bf16.mxu1 %v4177_v27 }
 0x71c   :  { %1858 = vmatmul.mubr.bf16.gmra.mxu1 %v4178_v28 }
 0x71d   :  { %1865 = vmatprep.mubr.bf16.mxu1 %v4179_v29 }
 0x724   :  { %1866 = vmatmul.mubr.bf16.gmra.mxu1 %v4180_v30 }
 0x76c   :  { %v2719_v33 = vpop.f32.mrf.mxu1 }
 0x76e   :  { %v2720_v35 = vpop.f32.mrf.mxu1 }
 0x76f   :  { %v2721_v53 = vadd.f32 %v2720_v35, %v2719_v33 }
 0x770   :  { %v2722_v36 = vpop.f32.mrf.mxu1 }
 0x772   :  { %v2723_v21 = vpop.f32.mrf.mxu1 }
 0x773   :  { %v2724_v31 = vadd.f32 %v2723_v21, %v2722_v36 }
 0x774   :  { %v2725_v38 = vpop.f32.mrf.mxu1 }
 0x775   :  { %v1874_v49 = vpack.c.bf16 %v2724_v31, %v2721_v53 }
 0x776   :  { %v2726_v32 = vpop.f32.mrf.mxu1 }
 0x777   :  { %2999 = vmatprep.mubr.bf16.mxu0 %v1874_v49  ;;  %v2727_v51 = vadd.f32 %v2726_v32, %v2725_v38 }
 0x778   :  { %v2728_v12 = vpop.f32.mrf.mxu1 }
 0x77a   :  { %v2729_v25 = vpop.f32.mrf.mxu1 }
 0x77b   :  { %v2730_v45 = vadd.f32 %v2729_v25, %v2728_v12 }
 0x77c   :  { %v2731_v11 = vpop.f32.mrf.mxu1 }
 0x77d   :  { %v1875_v62 = vpack.c.bf16 %v2730_v45, %v2727_v51 }
 0x77e   :  { %v2732_v0 = vpop.f32.mrf.mxu1 }
 0x77f   :  { %3000 = vmatmul.mubr.bf16.vlgmr.msra.gmra.mxu0 %v1875_v62  ;;  %v2733_v50 = vadd.f32 %v2732_v0, %v2731_v11 }
 0x780   :  { %v2734_v40 = vpop.f32.mrf.mxu1 }
 0x782   :  { %v2735_v44 = vpop.f32.mrf.mxu1 }
 0x783   :  { %v2736_v6 = vadd.f32 %v2735_v44, %v2734_v40 }
 0x784   :  { %v2737_v13 = vpop.f32.mrf.mxu1 }
 0x785   :  { %v1876_v43 = vpack.c.bf16 %v2736_v6, %v2733_v50 }
 0x786   :  { %v2738_v34 = vpop.f32.mrf.mxu1 }
 0x787   :  { %3003 = vmatprep.mubr.bf16.mxu0 %v1876_v43  ;;  %v2739_v1 = vadd.f32 %v2738_v34, %v2737_v13 }
 0x788   :  { %v2740_v41 = vpop.f32.mrf.mxu1 }
 0x78a   :  { %v2741_v58 = vpop.f32.mrf.mxu1 }
 0x78b   :  { %v2742_v4 = vadd.f32 %v2741_v58, %v2740_v41 }
 0x78c   :  { %v2743_v14 = vpop.f32.mrf.mxu1 }
 0x78d   :  { %v1877_v60 = vpack.c.bf16 %v2742_v4, %v2739_v1 }
 0x78e   :  { %v2744_v18 = vpop.f32.mrf.mxu1 }
 0x78f   :  { %3004 = vmatmul.mubr.bf16.gmra.mxu0 %v1877_v60  ;;  %v2745_v61 = vadd.f32 %v2744_v18, %v2743_v14 }
 0x790   :  { %v2746_v52 = vpop.f32.mrf.mxu1 }
 0x792   :  { %v2747_v23 = vpop.f32.mrf.mxu1 }
 0x793   :  { %v2748_v63 = vadd.f32 %v2747_v23, %v2746_v52 }
 0x794   :  { %v2749_v7 = vpop.f32.mrf.mxu1 }
 0x795   :  { %v1878_v2 = vpack.c.bf16 %v2748_v63, %v2745_v61 }
 0x796   :  { %v2750_v37 = vpop.f32.mrf.mxu1 }
 0x797   :  { %3007 = vmatprep.mubr.bf16.mxu0 %v1878_v2  ;;  %v2751_v20 = vadd.f32 %v2750_v37, %v2749_v7 }
 0x798   :  { %v2752_v57 = vpop.f32.mrf.mxu1 }
 0x79a   :  { %v2753_v8 = vpop.f32.mrf.mxu1 }
 0x79b   :  { %v2754_v46 = vadd.f32 %v2753_v8, %v2752_v57 }
 0x79c   :  { %v2755_v16 = vpop.f32.mrf.mxu1 }
 0x79d   :  { %v1879_v42 = vpack.c.bf16 %v2754_v46, %v2751_v20 }
 0x79e   :  { %v2756_v39 = vpop.f32.mrf.mxu1 }
 0x79f   :  { %3008 = vmatmul.mubr.bf16.gmra.mxu0 %v1879_v42  ;;  %v2757_v47 = vadd.f32 %v2756_v39, %v2755_v16 }
 0x7a0   :  { %v2758_v5 = vpop.f32.mrf.mxu1 }
 0x7a2   :  { %v2759_v59 = vpop.f32.mrf.mxu1 }
 0x7a3   :  { %v2760_v54 = vadd.f32 %v2759_v59, %v2758_v5 }
 0x7a4   :  { %v2761_v15 = vpop.f32.mrf.mxu1 }
 0x7a5   :  { %v1880_v24 = vpack.c.bf16 %v2760_v54, %v2757_v47 }
 0x7a6   :  { %v2762_v55 = vpop.f32.mrf.mxu1 }
 0x7a7   :  { %3011 = vmatprep.mubr.bf16.mxu0 %v1880_v24  ;;  %v2763_v22 = vadd.f32 %v2762_v55, %v2761_v15  ;;  %v3974_v15 = vld [vmem:[%s4107_s3 + $0x3] ss:$0 sm:$0xff] }
 0x7a8   :  { %v2764_v56 = vpop.f32.mrf.mxu1 }
 0x7aa   :  { %v2765_v3 = vpop.f32.mrf.mxu1 }
 0x7ab   :  { %v2766_v48 = vadd.f32 %v2765_v3, %v2764_v56 }
 0x7ac   :  { %v2767_v9 = vpop.f32.mrf.mxu1 }
 0x7ad   :  { %v1881_v10 = vpack.c.bf16 %v2766_v48, %v2763_v22 }
 0x7ae   :  { %v2768_v17 = vpop.f32.mrf.mxu1 }
 0x7af   :  { %3012 = vmatmul.mubr.bf16.gmra.mxu0 %v1881_v10  ;;  %v2769_v27 = vadd.f32 %v2768_v17, %v2767_v9 }
 0x7b0   :  { %v2770_v19 = vpop.f32.mrf.mxu1 }
 0x7b2   :  { %v2771_v26 = vpop.f32.mrf.mxu1 }
 0x7b3   :  { %v2772_v28 = vadd.f32 %v2771_v26, %v2770_v19 }
 0x7b4   :  { %v2773_v29 = vpop.f32.mrf.mxu1 }
 0x7b5   :  { %v1882_v30 = vpack.c.bf16 %v2772_v28, %v2769_v27 }
 0x7b6   :  { %v2774_v33 = vpop.f32.mrf.mxu1 }
 0x7b7   :  { %3015 = vmatprep.mubr.bf16.mxu0 %v1882_v30  ;;  %v2775_v21 = vadd.f32 %v2774_v33, %v2773_v29 }
 0x7b8   :  { %v2776_v35 = vpop.f32.mrf.mxu1 }
 0x7ba   :  { %v2777_v36 = vpop.f32.mrf.mxu1 }
 0x7bb   :  { %v2778_v53 = vadd.f32 %v2777_v36, %v2776_v35 }
 0x7bc   :  { %v2779_v31 = vpop.f32.mrf.mxu1 }
 0x7bd   :  { %v1883_v38 = vpack.c.bf16 %v2778_v53, %v2775_v21 }
 0x7be   :  { %v2780_v49 = vpop.f32.mrf.mxu1 }
 0x7bf   :  { %3016 = vmatmul.mubr.bf16.gmra.mxu0 %v1883_v38  ;;  %v2781_v25 = vadd.f32 %v2780_v49, %v2779_v31 }
 0x7c0   :  { %v2782_v32 = vpop.f32.mrf.mxu1 }
 0x7c2   :  { %v2783_v12 = vpop.f32.mrf.mxu1 }
 0x7c3   :  { %v2784_v51 = vadd.f32 %v2783_v12, %v2782_v32 }
 0x7c4   :  { %v2785_v45 = vpop.f32.mrf.mxu1 }
 0x7c5   :  { %v1884_v11 = vpack.c.bf16 %v2784_v51, %v2781_v25 }
 0x7c6   :  { %v2786_v62 = vpop.f32.mrf.mxu1 }
 0x7c7   :  { %3019 = vmatprep.mubr.bf16.mxu0 %v1884_v11  ;;  %v2787_v44 = vadd.f32 %v2786_v62, %v2785_v45 }
 0x7c8   :  { %v2788_v0 = vpop.f32.mrf.mxu1 }
 0x7ca   :  { %v2789_v40 = vpop.f32.mrf.mxu1 }
 0x7cb   :  { %v2790_v50 = vadd.f32 %v2789_v40, %v2788_v0 }
 0x7cc   :  { %v2791_v6 = vpop.f32.mrf.mxu1 }
 0x7cd   :  { %v1885_v13 = vpack.c.bf16 %v2790_v50, %v2787_v44 }
 0x7ce   :  { %v2792_v43 = vpop.f32.mrf.mxu1 }
 0x7cf   :  { %3020 = vmatmul.mubr.bf16.gmra.mxu0 %v1885_v13  ;;  %v2793_v58 = vadd.f32 %v2792_v43, %v2791_v6 }
 0x7d0   :  { %v2794_v34 = vpop.f32.mrf.mxu1 }
 0x7d2   :  { %v2795_v41 = vpop.f32.mrf.mxu1 }
 0x7d3   :  { %v2796_v1 = vadd.f32 %v2795_v41, %v2794_v34 }
 0x7d4   :  { %v2797_v4 = vpop.f32.mrf.mxu1 }
 0x7d5   :  { %v1886_v14 = vpack.c.bf16 %v2796_v1, %v2793_v58 }
 0x7d6   :  { %v2798_v60 = vpop.f32.mrf.mxu1 }
 0x7d7   :  { %3023 = vmatprep.mubr.bf16.mxu0 %v1886_v14  ;;  %v2799_v23 = vadd.f32 %v2798_v60, %v2797_v4 }
 0x7d8   :  { %v2800_v18 = vpop.f32.mrf.mxu1 }
 0x7da   :  { %v2801_v52 = vpop.f32.mrf.mxu1 }
 0x7db   :  { %v2802_v61 = vadd.f32 %v2801_v52, %v2800_v18 }
 0x7dc   :  { %v2803_v63 = vpop.f32.mrf.mxu1 }
 0x7dd   :  { %v1887_v7 = vpack.c.bf16 %v2802_v61, %v2799_v23 }
 0x7de   :  { %v2804_v2 = vpop.f32.mrf.mxu1 }
 0x7df   :  { %3024 = vmatmul.mubr.bf16.gmra.mxu0 %v1887_v7  ;;  %v2805_v8 = vadd.f32 %v2804_v2, %v2803_v63 }
 0x7e0   :  { %v2806_v37 = vpop.f32.mrf.mxu1 }
 0x7e2   :  { %v2807_v57 = vpop.f32.mrf.mxu1 }
 0x7e3   :  { %v2808_v20 = vadd.f32 %v2807_v57, %v2806_v37 }
 0x7e4   :  { %v2809_v46 = vpop.f32.mrf.mxu1 }
 0x7e5   :  { %v1888_v16 = vpack.c.bf16 %v2808_v20, %v2805_v8 }
 0x7e6   :  { %v2810_v42 = vpop.f32.mrf.mxu1 }
 0x7e7   :  { %3027 = vmatprep.mubr.bf16.mxu0 %v1888_v16  ;;  %v2811_v59 = vadd.f32 %v2810_v42, %v2809_v46 }
 0x7e8   :  { %v2812_v39 = vpop.f32.mrf.mxu1 }
 0x7ea   :  { %v2813_v5 = vpop.f32.mrf.mxu1 }
 0x7eb   :  { %v2814_v47 = vadd.f32 %v2813_v5, %v2812_v39 }
 0x7ed   :  { %v1889_v54 = vpack.c.bf16 %v2814_v47, %v2811_v59 }
 0x7ef   :  { %3028 = vmatmul.mubr.bf16.gmra.mxu0 %v1889_v54 }
 0x83f   :  { %v3001_v24 = vpop.f32.mrf.mxu0 }
 0x840   :  { %v2006_v55 = vadd.f32 %v3001_v24, %v3974_v15 }
 0x841   :  { %v1997_v56 = vpop.f32.mrf.mxu0 }
 0x842   :  { %2126 = vst [vmem:[%s4108_s4 + $0x10] sm:$0xff] %v2006_v55  ;;  %v1998_v3 = vadd.f32 %v3974_v15, %v1997_v56 }
 0x843   :  { %v3002_v22 = vpop.f32.mrf.mxu0 }
 0x844   :  { %2124 = vst [vmem:[%s4108_s4] sm:$0xff] %v1998_v3  ;;  %v2009_v48 = vadd.f32 %v3002_v22, %v3974_v15 }
 0x845   :  { %v2000_v9 = vpop.f32.mrf.mxu0 }
 0x846   :  { %2127 = vst [vmem:[%s4108_s4 + $0x18] sm:$0xff] %v2009_v48  ;;  %v2001_v10 = vadd.f32 %v3974_v15, %v2000_v9 }
 0x848   :  { %2125 = vst [vmem:[%s4108_s4 + $0x8] sm:$0xff] %v2001_v10 }
 0x84f   :  { %v3005_v17 = vpop.f32.mrf.mxu0 }
 0x850   :  { %v2022_v19 = vadd.f32 %v3005_v17, %v3974_v15 }
 0x851   :  { %v2013_v26 = vpop.f32.mrf.mxu0 }
 0x852   :  { %2130 = vst [vmem:[%s4108_s4 + $0x30] sm:$0xff] %v2022_v19  ;;  %v2014_v27 = vadd.f32 %v3974_v15, %v2013_v26 }
 0x853   :  { %v3006_v28 = vpop.f32.mrf.mxu0 }
 0x854   :  { %2128 = vst [vmem:[%s4108_s4 + $0x20] sm:$0xff] %v2014_v27  ;;  %v2025_v29 = vadd.f32 %v3006_v28, %v3974_v15 }
 0x855   :  { %v2016_v30 = vpop.f32.mrf.mxu0 }
 0x856   :  { %2131 = vst [vmem:[%s4108_s4 + $0x38] sm:$0xff] %v2025_v29  ;;  %v2017_v33 = vadd.f32 %v3974_v15, %v2016_v30 }
 0x858   :  { %2129 = vst [vmem:[%s4108_s4 + $0x28] sm:$0xff] %v2017_v33 }
 0x85f   :  { %v3009_v35 = vpop.f32.mrf.mxu0 }
 0x860   :  { %v2038_v36 = vadd.f32 %v3009_v35, %v3974_v15 }
 0x861   :  { %v2029_v21 = vpop.f32.mrf.mxu0 }
 0x862   :  { %2134 = vst [vmem:[%s4108_s4 + $0x50] sm:$0xff] %v2038_v36  ;;  %v2030_v53 = vadd.f32 %v3974_v15, %v2029_v21 }
 0x863   :  { %v3010_v31 = vpop.f32.mrf.mxu0 }
 0x864   :  { %2132 = vst [vmem:[%s4108_s4 + $0x40] sm:$0xff] %v2030_v53  ;;  %v2041_v38 = vadd.f32 %v3010_v31, %v3974_v15 }
 0x865   :  { %v2032_v49 = vpop.f32.mrf.mxu0 }
 0x866   :  { %2135 = vst [vmem:[%s4108_s4 + $0x58] sm:$0xff] %v2041_v38  ;;  %v2033_v32 = vadd.f32 %v3974_v15, %v2032_v49 }
 0x868   :  { %2133 = vst [vmem:[%s4108_s4 + $0x48] sm:$0xff] %v2033_v32 }
 0x86f   :  { %v3013_v12 = vpop.f32.mrf.mxu0 }
 0x870   :  { %v2054_v25 = vadd.f32 %v3013_v12, %v3974_v15 }
 0x871   :  { %v2045_v51 = vpop.f32.mrf.mxu0 }
 0x872   :  { %2138 = vst [vmem:[%s4108_s4 + $0x70] sm:$0xff] %v2054_v25  ;;  %v2046_v45 = vadd.f32 %v3974_v15, %v2045_v51 }
 0x873   :  { %v3014_v11 = vpop.f32.mrf.mxu0 }
 0x874   :  { %2136 = vst [vmem:[%s4108_s4 + $0x60] sm:$0xff] %v2046_v45  ;;  %v2057_v62 = vadd.f32 %v3014_v11, %v3974_v15 }
 0x875   :  { %v2048_v0 = vpop.f32.mrf.mxu0 }
 0x876   :  { %2139 = vst [vmem:[%s4108_s4 + $0x78] sm:$0xff] %v2057_v62  ;;  %v2049_v40 = vadd.f32 %v3974_v15, %v2048_v0 }
 0x878   :  { %2137 = vst [vmem:[%s4108_s4 + $0x68] sm:$0xff] %v2049_v40 }
 0x87f   :  { %v3017_v44 = vpop.f32.mrf.mxu0 }
 0x880   :  { %v2070_v50 = vadd.f32 %v3017_v44, %v3974_v15 }
 0x881   :  { %v2061_v6 = vpop.f32.mrf.mxu0 }
 0x882   :  { %2142 = vst [vmem:[%s4108_s4 + $0x90] sm:$0xff] %v2070_v50  ;;  %v2062_v13 = vadd.f32 %v3974_v15, %v2061_v6 }
 0x883   :  { %v3018_v43 = vpop.f32.mrf.mxu0 }
 0x884   :  { %2140 = vst [vmem:[%s4108_s4 + $0x80] sm:$0xff] %v2062_v13  ;;  %v2073_v34 = vadd.f32 %v3018_v43, %v3974_v15 }
 0x885   :  { %v2064_v41 = vpop.f32.mrf.mxu0 }
 0x886   :  { %2143 = vst [vmem:[%s4108_s4 + $0x98] sm:$0xff] %v2073_v34  ;;  %v2065_v58 = vadd.f32 %v3974_v15, %v2064_v41 }
 0x888   :  { %2141 = vst [vmem:[%s4108_s4 + $0x88] sm:$0xff] %v2065_v58 }
 0x88f   :  { %v3021_v1 = vpop.f32.mrf.mxu0 }
 0x890   :  { %v2086_v4 = vadd.f32 %v3021_v1, %v3974_v15 }
 0x891   :  { %v2077_v14 = vpop.f32.mrf.mxu0 }
 0x892   :  { %2146 = vst [vmem:[%s4108_s4 + $0xb0] sm:$0xff] %v2086_v4  ;;  %v2078_v60 = vadd.f32 %v3974_v15, %v2077_v14 }
 0x893   :  { %v3022_v18 = vpop.f32.mrf.mxu0 }
 0x894   :  { %2144 = vst [vmem:[%s4108_s4 + $0xa0] sm:$0xff] %v2078_v60  ;;  %v2089_v52 = vadd.f32 %v3022_v18, %v3974_v15 }
 0x895   :  { %v2080_v23 = vpop.f32.mrf.mxu0 }
 0x896   :  { %2147 = vst [vmem:[%s4108_s4 + $0xb8] sm:$0xff] %v2089_v52  ;;  %v2081_v61 = vadd.f32 %v3974_v15, %v2080_v23 }
 0x898   :  { %2145 = vst [vmem:[%s4108_s4 + $0xa8] sm:$0xff] %v2081_v61 }
 0x89f   :  { %v3025_v63 = vpop.f32.mrf.mxu0 }
 0x8a0   :  { %v2102_v7 = vadd.f32 %v3025_v63, %v3974_v15 }
 0x8a1   :  { %v2093_v2 = vpop.f32.mrf.mxu0 }
 0x8a2   :  { %2150 = vst [vmem:[%s4108_s4 + $0xd0] sm:$0xff] %v2102_v7  ;;  %v2094_v37 = vadd.f32 %v3974_v15, %v2093_v2 }
 0x8a3   :  { %v3026_v57 = vpop.f32.mrf.mxu0 }
 0x8a4   :  { %2148 = vst [vmem:[%s4108_s4 + $0xc0] sm:$0xff] %v2094_v37  ;;  %v2105_v8 = vadd.f32 %v3026_v57, %v3974_v15 }
 0x8a5   :  { %v2096_v20 = vpop.f32.mrf.mxu0 }
 0x8a6   :  { %2151 = vst [vmem:[%s4108_s4 + $0xd8] sm:$0xff] %v2105_v8  ;;  %v2097_v46 = vadd.f32 %v3974_v15, %v2096_v20 }
 0x8a8   :  { %2149 = vst [vmem:[%s4108_s4 + $0xc8] sm:$0xff] %v2097_v46 }
 0x8af   :  { %v3029_v16 = vpop.f32.mrf.mxu0 }
 0x8b0   :  { %v2118_v42 = vadd.f32 %v3029_v16, %v3974_v15 }
 0x8b1   :  { %v2109_v39 = vpop.f32.mrf.mxu0 }
 0x8b2   :  { %2154 = vst [vmem:[%s4108_s4 + $0xf0] sm:$0xff] %v2118_v42  ;;  %v2110_v5 = vadd.f32 %v3974_v15, %v2109_v39 }
 0x8b3   :  { %v3030_v59 = vpop.f32.mrf.mxu0 }
 0x8b4   :  { %2152 = vst [vmem:[%s4108_s4 + $0xe0] sm:$0xff] %v2110_v5  ;;  %v2121_v47 = vadd.f32 %v3030_v59, %v3974_v15 }
 0x8b5   :  { %v2112_v54 = vpop.f32.mrf.mxu0 }
 0x8b6   :  { %2155 = vst [vmem:[%s4108_s4 + $0xf8] sm:$0xff] %v2121_v47  ;;  %v2113_v24 = vadd.f32 %v3974_v15, %v2112_v54 }
 0x8b8   :  { %2153 = vst [vmem:[%s4108_s4 + $0xe8] sm:$0xff] %v2113_v24 }

</bundles_post_ra>
